<compile_context>
chip_gen: v6e
topology: v6e:2x2x1
jax: 0.10.0
libtpu: 0.0.40
codegen_flags: <defaults>
</compile_context>

<pallas_src>
import jax
import jax.numpy as jnp
from jax import lax
from jax.experimental import pallas as pl
from jax.experimental.pallas import tpu as pltpu

N_BATCH = 2
HIDDEN_SIZE = 32
CLS_NUM = 12  # fc3 exists in __init__ but is not used in forward()


# ---------------------------------------------------------------------------
# Fused per-sample kernel:
#   conv1+relu+pool -> conv2+relu+pool -> flatten -> fc1+relu -> fc2+relu
# Intermediate layouts (all live in vregs, f32):
#   y1  : (28, 168)  y1[i, co*28 + j]       = relu(conv1)[co, i, j]
#   cw1 : (28, 167)  cw1[i, c]              = max(y1[i, c], y1[i, c+1])
#   y2  : (19, 160)  y2[2*i2, co*10 + j]    = relu(conv2)[co, i2, j]  (odd rows unused)
#   cw2 : (19, 159)  cw2[r, c]              = max(y2[r, c], y2[r, c+1])
#   row : (1, 159)   row_i[0, co*10 + 2*j2] = maxpool2(relu(conv2))[co, i, j2]
# Even-column / even-row selection is folded into a2 / wf1 (zero weight elsewhere).
# ---------------------------------------------------------------------------
def _classifier_kernel(x_ref, a1_ref, a2_ref, wf1_ref, wf2t_ref, bias_ref, out_ref):
    bf16 = jnp.bfloat16
    hidden = out_ref.shape[1]

    def dot(a, b):
        return jnp.dot(a, b, preferred_element_type=jnp.float32)

    # ---- conv1: 5 accumulated row-shifted matmuls (28,32)@(32,168) ------------
    y1 = dot(x_ref[0:28, :].astype(bf16), a1_ref[0])
    for ki in range(1, 5):
        y1 += dot(x_ref[ki:ki + 28, :].astype(bf16), a1_ref[ki])
    y1 = jnp.maximum(y1 + bias_ref[0:1, 0:168], 0.0)

    # ---- stage-1 pool, column half: pairs (c, c+1); valid at even c -----------
    cw1 = jnp.maximum(y1[:, 0:167], y1[:, 1:168])                  # (28, 167)

    # ---- conv2: 5 accumulated matmuls (19,167)@(167,160); the stage-1 row pool
    #      is the per-tap two-row max; stride-2 row selection is implicit
    #      (only even output rows are valid / consumed downstream) --------------
    y2 = dot(jnp.maximum(cw1[0:19, :], cw1[1:20, :]).astype(bf16), a2_ref[0])
    for ki in range(1, 5):
        tap = jnp.maximum(cw1[2 * ki:2 * ki + 19, :],
                          cw1[2 * ki + 1:2 * ki + 20, :])          # (19, 167)
        y2 += dot(tap.astype(bf16), a2_ref[ki])
    y2 = jnp.maximum(y2 + bias_ref[1:2, 0:160], 0.0)               # (19, 160)

    # ---- stage-2 pool, column half --------------------------------------------
    cw2 = jnp.maximum(y2[:, 0:159], y2[:, 1:160])                  # (19, 159)

    # ---- fc1: flatten + stage-2 row pool folded into 5 single-row matmuls -----
    h1 = dot(jnp.maximum(cw2[0:1, :], cw2[2:3, :]).astype(bf16), wf1_ref[0])
    for i in range(1, 5):
        row = jnp.maximum(cw2[4 * i:4 * i + 1, :],
                          cw2[4 * i + 2:4 * i + 3, :])             # (1, 159)
        h1 += dot(row.astype(bf16), wf1_ref[i])
    h1 = jnp.maximum(h1 + bias_ref[2:3, 0:120], 0.0)               # (1, 120)

    # ---- fc2 + ReLU ------------------------------------------------------------
    h2 = dot(h1.astype(bf16), wf2t_ref[...]) + bias_ref[3:4, 0:hidden]
    out_ref[...] = jnp.maximum(h2, 0.0)                            # (1, hidden)


# ---------------------------------------------------------------------------
# One-time host-side parameter preparation
# ---------------------------------------------------------------------------
def _conv1_taps(w1):
    """(6,1,5,5) -> (5, 32, 168): a1[ki, p, co*28+j] = w1[co,0,ki,p-j] for 0<=p-j<=4."""
    w = w1[:, 0]                                            # (6, 5, 5)
    ki = jnp.arange(5)[:, None, None, None]
    p = jnp.arange(32)[None, :, None, None]
    co = jnp.arange(6)[None, None, :, None]
    j = jnp.arange(28)[None, None, None, :]
    kj = p - j
    valid = (kj >= 0) & (kj <= 4)
    vals = jnp.where(valid, w[co, ki, jnp.clip(kj, 0, 4)], 0.0)    # (5, 32, 6, 28)
    return vals.reshape(5, 32, 6 * 28)


def _conv2_taps(w2):
    """(16,6,5,5) -> (5, 167, 160): a2[ki, ci*28+p, co*10+j] = w2[co,ci,ki,(p-2j)/2]
    for even p with 0 <= (p-2j)/2 <= 4, else 0 (odd cw1 columns carry no weight)."""
    ki = jnp.arange(5)[:, None, None, None, None]
    ci = jnp.arange(6)[None, :, None, None, None]
    p = jnp.arange(28)[None, None, :, None, None]
    co = jnp.arange(16)[None, None, None, :, None]
    j = jnp.arange(10)[None, None, None, None, :]
    d = p - 2 * j
    valid = (p % 2 == 0) & (d >= 0) & (d <= 8)
    kj = jnp.clip(d // 2, 0, 4)
    vals = jnp.where(valid, w2[co, ci, ki, kj], 0.0)               # (5, 6, 28, 16, 10)
    return vals.reshape(5, 6 * 28, 16 * 10)[:, :167, :]            # drop all-zero row 167


def _fc1_taps(fc1_w):
    """(120, 400) -> (5, 159, 120): wf1[i, co*10+p, m] = fc1_w[m, co*25 + i*5 + p//2]
    for even p, else 0.  Leading index i is the pooled spatial row (flatten fold)."""
    i = jnp.arange(5)[:, None, None, None]
    co = jnp.arange(16)[None, :, None, None]
    p = jnp.arange(10)[None, None, :, None]
    m = jnp.arange(120)[None, None, None, :]
    valid = (p % 2 == 0)
    col = co * 25 + i * 5 + p // 2
    vals = jnp.where(valid, fc1_w[m, col], 0.0)                    # (5, 16, 10, 120)
    return vals.reshape(5, 16 * 10, 120)[:, :159, :]               # drop all-zero row 159


def prepare_params(params):
    """Convert torch-layout params into kernel-ready constants (call once).
    Not batch-size dependent: batch is a grid axis of the kernel."""
    hidden = params["fc2_w"].shape[0]
    bw = max(168, hidden)
    bias = jnp.zeros((4, bw), jnp.float32)
    bias = bias.at[0, 0:168].set(jnp.repeat(params["conv1_b"], 28))
    bias = bias.at[1, 0:160].set(jnp.repeat(params["conv2_b"], 10))
    bias = bias.at[2, 0:120].set(params["fc1_b"])
    bias = bias.at[3, 0:hidden].set(params["fc2_b"])
    return {
        "a1": _conv1_taps(params["conv1_w"]).astype(jnp.bfloat16),     # (5, 32, 168)
        "a2": _conv2_taps(params["conv2_w"]).astype(jnp.bfloat16),     # (5, 167, 160)
        "wf1": _fc1_taps(params["fc1_w"]).astype(jnp.bfloat16),        # (5, 159, 120)
        "wf2t": params["fc2_w"].T.astype(jnp.bfloat16),                # (120, hidden)
        "bias": bias,                                                  # (4, >=168) f32
    }


def _uniform(key, shape, fan_in):
    bound = 1.0 / (fan_in ** 0.5)
    return jax.random.uniform(key, shape, jnp.float32, -bound, bound)


def init_params(key, hidden_size=HIDDEN_SIZE):
    ks = jax.random.split(key, 8)
    return {
        "conv1_w": _uniform(ks[0], (6, 1, 5, 5), 1 * 5 * 5),
        "conv1_b": _uniform(ks[1], (6,), 1 * 5 * 5),
        "conv2_w": _uniform(ks[2], (16, 6, 5, 5), 6 * 5 * 5),
        "conv2_b": _uniform(ks[3], (16,), 6 * 5 * 5),
        "fc1_w": _uniform(ks[4], (120, 16 * 5 * 5), 16 * 5 * 5),   # torch layout (out, in)
        "fc1_b": _uniform(ks[5], (120,), 16 * 5 * 5),
        "fc2_w": _uniform(ks[6], (hidden_size, 120), 120),
        "fc2_b": _uniform(ks[7], (hidden_size,), 120),
        # TODO(synk): fc3 (hidden -> cls_num) and CrossEntropyLoss exist in __init__
        # but are never used in forward(); intentionally not materialized here.
    }


# ---------------------------------------------------------------------------
# Forward
# ---------------------------------------------------------------------------
@jax.jit
def classifier_forward(prepped, x):
    """x: (N, 1, 32, 32) float32 -> (N, hidden) float32.  One fused Pallas kernel,
    one sample per grid step ("parallel" -> both TensorCores used on v7x)."""
    n = x.shape[0]
    hidden = prepped["wf2t"].shape[1]
    bw = prepped["bias"].shape[1]
    x3 = x.reshape(n, 32, 32)   # metadata-only: drop the singleton channel
    out = pl.pallas_call(
        _classifier_kernel,
        out_shape=jax.ShapeDtypeStruct((n, 1, hidden), jnp.float32),
        grid=(n,),
        in_specs=[
            pl.BlockSpec((None, 32, 32), lambda b: (b, 0, 0)),     # per-sample input
            pl.BlockSpec((5, 32, 168), lambda b: (0, 0, 0)),       # conv1 taps (bf16)
            pl.BlockSpec((5, 167, 160), lambda b: (0, 0, 0)),      # conv2 taps (bf16)
            pl.BlockSpec((5, 159, 120), lambda b: (0, 0, 0)),      # fc1 taps   (bf16)
            pl.BlockSpec((120, hidden), lambda b: (0, 0)),         # fc2 weight (bf16)
            pl.BlockSpec((4, bw), lambda b: (0, 0)),               # packed biases (f32)
        ],
        out_specs=pl.BlockSpec((None, 1, hidden), lambda b: (b, 0, 0)),
        compiler_params=pltpu.CompilerParams(
            dimension_semantics=("parallel",)),
    )(x3, prepped["a1"], prepped["a2"], prepped["wf1"],
      prepped["wf2t"], prepped["bias"])
    return out.reshape(n, hidden)


# Pure-JAX reference (for self-validation only).
def _reference_forward(params, x):
    dn = ("NCHW", "OIHW", "NCHW")
    y = lax.conv_general_dilated(x, params["conv1_w"], (1, 1), "VALID",
                                 dimension_numbers=dn)
    y = jnp.maximum(y + params["conv1_b"][None, :, None, None], 0.0)
    y = lax.reduce_window(y, -jnp.inf, lax.max, (1, 1, 2, 2), (1, 1, 2, 2), "VALID")
    y = lax.conv_general_dilated(y, params["conv2_w"], (1, 1), "VALID",
                                 dimension_numbers=dn)
    y = jnp.maximum(y + params["conv2_b"][None, :, None, None], 0.0)
    y = lax.reduce_window(y, -jnp.inf, lax.max, (1, 1, 2, 2), (1, 1, 2, 2), "VALID")
    f = y.reshape(y.shape[0], -1)
    h = jnp.maximum(f @ params["fc1_w"].T + params["fc1_b"], 0.0)
    return jnp.maximum(h @ params["fc2_w"].T + params["fc2_b"], 0.0)


if __name__ == "__main__":
    key = jax.random.PRNGKey(0)
    k_params, k_x = jax.random.split(key)
    params = init_params(k_params, HIDDEN_SIZE)
    prepped = prepare_params(params)

    # Input must be (N, 1, 32, 32) so that after two conv5+pool2 stages the spatial
    # map is 5x5 (16*5*5 = 400 features), exactly as the module assumes.
    x = jax.random.normal(k_x, (N_BATCH, 1, 32, 32), dtype=jnp.float32)

    out = jax.block_until_ready(classifier_forward(prepped, x))
    assert out.shape == (N_BATCH, HIDDEN_SIZE)

    ref = jax.block_until_ready(_reference_forward(params, x))
    err = float(jnp.max(jnp.abs(out - ref)))
    assert err < 6e-2, f"kernel/reference mismatch: max abs err={err}"
    print("KERNEL_OK")
</pallas_src>

<mosaic_0001>
module attributes {stable_mosaic.version = 11 : i64} {
  func.func @_classifier_kernel(%arg0: i32, %arg1: memref<1x32x32xf32, #tpu.memory_space<vmem>>, %arg2: memref<5x32x168xbf16, #tpu.memory_space<vmem>>, %arg3: memref<5x167x160xbf16, #tpu.memory_space<vmem>>, %arg4: memref<5x159x120xbf16, #tpu.memory_space<vmem>>, %arg5: memref<120x32xbf16, #tpu.memory_space<vmem>>, %arg6: memref<4x168xf32, #tpu.memory_space<vmem>>, %arg7: memref<1x1x32xf32, #tpu.memory_space<vmem>>) attributes {dimension_semantics = [#tpu.dimension_semantics<parallel>], iteration_bounds = array<i64: 2>, scalar_prefetch = 0 : i64, scratch_operands = 0 : i64, tpu.core_type = #tpu.core_type<tc>, window_params = [{transform_indices = @transform_0, window_bounds = array<i64: 1, 32, 32>}, {pipeline_mode = #tpu.pipeline_mode<synchronous>, transform_indices = @transform_1, window_bounds = array<i64: 5, 32, 168>}, {pipeline_mode = #tpu.pipeline_mode<synchronous>, transform_indices = @transform_2, window_bounds = array<i64: 5, 167, 160>}, {pipeline_mode = #tpu.pipeline_mode<synchronous>, transform_indices = @transform_3, window_bounds = array<i64: 5, 159, 120>}, {pipeline_mode = #tpu.pipeline_mode<synchronous>, transform_indices = @transform_4, window_bounds = array<i64: 120, 32>}, {pipeline_mode = #tpu.pipeline_mode<synchronous>, transform_indices = @transform_5, window_bounds = array<i64: 4, 168>}, {transform_indices = @transform_6, window_bounds = array<i64: 1, 1, 32>}]} {
    %c0 = arith.constant 0 : index
    %c0_0 = arith.constant 0 : index
    %c0_1 = arith.constant 0 : index
    %0 = vector.load %arg1[%c0, %c0_0, %c0_1] : memref<1x32x32xf32, #tpu.memory_space<vmem>>, vector<1x28x32xf32>
    %1 = vector.shape_cast %0 : vector<1x28x32xf32> to vector<28x32xf32>
    %2 = arith.truncf %1 : vector<28x32xf32> to vector<28x32xbf16>
    %c0_2 = arith.constant 0 : index
    %c0_3 = arith.constant 0 : index
    %c0_4 = arith.constant 0 : index
    %3 = vector.load %arg2[%c0_2, %c0_3, %c0_4] : memref<5x32x168xbf16, #tpu.memory_space<vmem>>, vector<1x32x168xbf16>
    %4 = vector.shape_cast %3 : vector<1x32x168xbf16> to vector<32x168xbf16>
    %cst = arith.constant dense<0.000000e+00> : vector<28x168xf32>
    %5 = tpu.matmul %2, %4, %cst {dimension_numbers = #tpu.dot_dimension_numbers<[1], [0], [0], [1], [0, 0, 1, 1], [], []>} : vector<28x32xbf16>, vector<32x168xbf16>, vector<28x168xf32> -> vector<28x168xf32>
    %c0_5 = arith.constant 0 : index
    %c1 = arith.constant 1 : index
    %c0_6 = arith.constant 0 : index
    %6 = vector.load %arg1[%c0_5, %c1, %c0_6] : memref<1x32x32xf32, #tpu.memory_space<vmem>>, vector<1x28x32xf32>
    %7 = vector.shape_cast %6 : vector<1x28x32xf32> to vector<28x32xf32>
    %8 = arith.truncf %7 : vector<28x32xf32> to vector<28x32xbf16>
    %c1_7 = arith.constant 1 : index
    %c0_8 = arith.constant 0 : index
    %c0_9 = arith.constant 0 : index
    %9 = vector.load %arg2[%c1_7, %c0_8, %c0_9] : memref<5x32x168xbf16, #tpu.memory_space<vmem>>, vector<1x32x168xbf16>
    %10 = vector.shape_cast %9 : vector<1x32x168xbf16> to vector<32x168xbf16>
    %cst_10 = arith.constant dense<0.000000e+00> : vector<28x168xf32>
    %11 = tpu.matmul %8, %10, %cst_10 {dimension_numbers = #tpu.dot_dimension_numbers<[1], [0], [0], [1], [0, 0, 1, 1], [], []>} : vector<28x32xbf16>, vector<32x168xbf16>, vector<28x168xf32> -> vector<28x168xf32>
    %12 = arith.addf %5, %11 : vector<28x168xf32>
    %c0_11 = arith.constant 0 : index
    %c2 = arith.constant 2 : index
    %c0_12 = arith.constant 0 : index
    %13 = vector.load %arg1[%c0_11, %c2, %c0_12] : memref<1x32x32xf32, #tpu.memory_space<vmem>>, vector<1x28x32xf32>
    %14 = vector.shape_cast %13 : vector<1x28x32xf32> to vector<28x32xf32>
    %15 = arith.truncf %14 : vector<28x32xf32> to vector<28x32xbf16>
    %c2_13 = arith.constant 2 : index
    %c0_14 = arith.constant 0 : index
    %c0_15 = arith.constant 0 : index
    %16 = vector.load %arg2[%c2_13, %c0_14, %c0_15] : memref<5x32x168xbf16, #tpu.memory_space<vmem>>, vector<1x32x168xbf16>
    %17 = vector.shape_cast %16 : vector<1x32x168xbf16> to vector<32x168xbf16>
    %cst_16 = arith.constant dense<0.000000e+00> : vector<28x168xf32>
    %18 = tpu.matmul %15, %17, %cst_16 {dimension_numbers = #tpu.dot_dimension_numbers<[1], [0], [0], [1], [0, 0, 1, 1], [], []>} : vector<28x32xbf16>, vector<32x168xbf16>, vector<28x168xf32> -> vector<28x168xf32>
    %19 = arith.addf %12, %18 : vector<28x168xf32>
    %c0_17 = arith.constant 0 : index
    %c3 = arith.constant 3 : index
    %c0_18 = arith.constant 0 : index
    %20 = vector.load %arg1[%c0_17, %c3, %c0_18] : memref<1x32x32xf32, #tpu.memory_space<vmem>>, vector<1x28x32xf32>
    %21 = vector.shape_cast %20 : vector<1x28x32xf32> to vector<28x32xf32>
    %22 = arith.truncf %21 : vector<28x32xf32> to vector<28x32xbf16>
    %c3_19 = arith.constant 3 : index
    %c0_20 = arith.constant 0 : index
    %c0_21 = arith.constant 0 : index
    %23 = vector.load %arg2[%c3_19, %c0_20, %c0_21] : memref<5x32x168xbf16, #tpu.memory_space<vmem>>, vector<1x32x168xbf16>
    %24 = vector.shape_cast %23 : vector<1x32x168xbf16> to vector<32x168xbf16>
    %cst_22 = arith.constant dense<0.000000e+00> : vector<28x168xf32>
    %25 = tpu.matmul %22, %24, %cst_22 {dimension_numbers = #tpu.dot_dimension_numbers<[1], [0], [0], [1], [0, 0, 1, 1], [], []>} : vector<28x32xbf16>, vector<32x168xbf16>, vector<28x168xf32> -> vector<28x168xf32>
    %26 = arith.addf %19, %25 : vector<28x168xf32>
    %c0_23 = arith.constant 0 : index
    %c4 = arith.constant 4 : index
    %c0_24 = arith.constant 0 : index
    %27 = vector.load %arg1[%c0_23, %c4, %c0_24] : memref<1x32x32xf32, #tpu.memory_space<vmem>>, vector<1x28x32xf32>
    %28 = vector.shape_cast %27 : vector<1x28x32xf32> to vector<28x32xf32>
    %29 = arith.truncf %28 : vector<28x32xf32> to vector<28x32xbf16>
    %c4_25 = arith.constant 4 : index
    %c0_26 = arith.constant 0 : index
    %c0_27 = arith.constant 0 : index
    %30 = vector.load %arg2[%c4_25, %c0_26, %c0_27] : memref<5x32x168xbf16, #tpu.memory_space<vmem>>, vector<1x32x168xbf16>
    %31 = vector.shape_cast %30 : vector<1x32x168xbf16> to vector<32x168xbf16>
    %cst_28 = arith.constant dense<0.000000e+00> : vector<28x168xf32>
    %32 = tpu.matmul %29, %31, %cst_28 {dimension_numbers = #tpu.dot_dimension_numbers<[1], [0], [0], [1], [0, 0, 1, 1], [], []>} : vector<28x32xbf16>, vector<32x168xbf16>, vector<28x168xf32> -> vector<28x168xf32>
    %33 = arith.addf %26, %32 : vector<28x168xf32>
    %c0_29 = arith.constant 0 : index
    %c0_30 = arith.constant 0 : index
    %34 = vector.load %arg6[%c0_29, %c0_30] : memref<4x168xf32, #tpu.memory_space<vmem>>, vector<1x168xf32>
    %35 = vector.broadcast %34 : vector<1x168xf32> to vector<28x168xf32>
    %36 = arith.addf %33, %35 : vector<28x168xf32>
    %cst_31 = arith.constant 0.000000e+00 : f32
    %37 = vector.broadcast %cst_31 : f32 to vector<28x168xf32>
    %38 = arith.maximumf %36, %37 : vector<28x168xf32>
    %39 = vector.extract_strided_slice %38 {offsets = [0, 0], sizes = [28, 167], strides = [1, 1]} : vector<28x168xf32> to vector<28x167xf32>
    %40 = vector.extract_strided_slice %38 {offsets = [0, 1], sizes = [28, 167], strides = [1, 1]} : vector<28x168xf32> to vector<28x167xf32>
    %41 = arith.maximumf %39, %40 : vector<28x167xf32>
    %42 = vector.extract_strided_slice %41 {offsets = [0, 0], sizes = [19, 167], strides = [1, 1]} : vector<28x167xf32> to vector<19x167xf32>
    %43 = vector.extract_strided_slice %41 {offsets = [1, 0], sizes = [19, 167], strides = [1, 1]} : vector<28x167xf32> to vector<19x167xf32>
    %44 = arith.maximumf %42, %43 : vector<19x167xf32>
    %45 = arith.truncf %44 : vector<19x167xf32> to vector<19x167xbf16>
    %c0_32 = arith.constant 0 : index
    %c0_33 = arith.constant 0 : index
    %c0_34 = arith.constant 0 : index
    %46 = vector.load %arg3[%c0_32, %c0_33, %c0_34] : memref<5x167x160xbf16, #tpu.memory_space<vmem>>, vector<1x167x160xbf16>
    %47 = vector.shape_cast %46 : vector<1x167x160xbf16> to vector<167x160xbf16>
    %cst_35 = arith.constant dense<0.000000e+00> : vector<19x160xf32>
    %48 = tpu.matmul %45, %47, %cst_35 {dimension_numbers = #tpu.dot_dimension_numbers<[1], [0], [0], [1], [0, 0, 1, 1], [], []>} : vector<19x167xbf16>, vector<167x160xbf16>, vector<19x160xf32> -> vector<19x160xf32>
    %49 = vector.extract_strided_slice %41 {offsets = [2, 0], sizes = [19, 167], strides = [1, 1]} : vector<28x167xf32> to vector<19x167xf32>
    %50 = vector.extract_strided_slice %41 {offsets = [3, 0], sizes = [19, 167], strides = [1, 1]} : vector<28x167xf32> to vector<19x167xf32>
    %51 = arith.maximumf %49, %50 : vector<19x167xf32>
    %52 = arith.truncf %51 : vector<19x167xf32> to vector<19x167xbf16>
    %c1_36 = arith.constant 1 : index
    %c0_37 = arith.constant 0 : index
    %c0_38 = arith.constant 0 : index
    %53 = vector.load %arg3[%c1_36, %c0_37, %c0_38] : memref<5x167x160xbf16, #tpu.memory_space<vmem>>, vector<1x167x160xbf16>
    %54 = vector.shape_cast %53 : vector<1x167x160xbf16> to vector<167x160xbf16>
    %cst_39 = arith.constant dense<0.000000e+00> : vector<19x160xf32>
    %55 = tpu.matmul %52, %54, %cst_39 {dimension_numbers = #tpu.dot_dimension_numbers<[1], [0], [0], [1], [0, 0, 1, 1], [], []>} : vector<19x167xbf16>, vector<167x160xbf16>, vector<19x160xf32> -> vector<19x160xf32>
    %56 = arith.addf %48, %55 : vector<19x160xf32>
    %57 = vector.extract_strided_slice %41 {offsets = [4, 0], sizes = [19, 167], strides = [1, 1]} : vector<28x167xf32> to vector<19x167xf32>
    %58 = vector.extract_strided_slice %41 {offsets = [5, 0], sizes = [19, 167], strides = [1, 1]} : vector<28x167xf32> to vector<19x167xf32>
    %59 = arith.maximumf %57, %58 : vector<19x167xf32>
    %60 = arith.truncf %59 : vector<19x167xf32> to vector<19x167xbf16>
    %c2_40 = arith.constant 2 : index
    %c0_41 = arith.constant 0 : index
    %c0_42 = arith.constant 0 : index
    %61 = vector.load %arg3[%c2_40, %c0_41, %c0_42] : memref<5x167x160xbf16, #tpu.memory_space<vmem>>, vector<1x167x160xbf16>
    %62 = vector.shape_cast %61 : vector<1x167x160xbf16> to vector<167x160xbf16>
    %cst_43 = arith.constant dense<0.000000e+00> : vector<19x160xf32>
    %63 = tpu.matmul %60, %62, %cst_43 {dimension_numbers = #tpu.dot_dimension_numbers<[1], [0], [0], [1], [0, 0, 1, 1], [], []>} : vector<19x167xbf16>, vector<167x160xbf16>, vector<19x160xf32> -> vector<19x160xf32>
    %64 = arith.addf %56, %63 : vector<19x160xf32>
    %65 = vector.extract_strided_slice %41 {offsets = [6, 0], sizes = [19, 167], strides = [1, 1]} : vector<28x167xf32> to vector<19x167xf32>
    %66 = vector.extract_strided_slice %41 {offsets = [7, 0], sizes = [19, 167], strides = [1, 1]} : vector<28x167xf32> to vector<19x167xf32>
    %67 = arith.maximumf %65, %66 : vector<19x167xf32>
    %68 = arith.truncf %67 : vector<19x167xf32> to vector<19x167xbf16>
    %c3_44 = arith.constant 3 : index
    %c0_45 = arith.constant 0 : index
    %c0_46 = arith.constant 0 : index
    %69 = vector.load %arg3[%c3_44, %c0_45, %c0_46] : memref<5x167x160xbf16, #tpu.memory_space<vmem>>, vector<1x167x160xbf16>
    %70 = vector.shape_cast %69 : vector<1x167x160xbf16> to vector<167x160xbf16>
    %cst_47 = arith.constant dense<0.000000e+00> : vector<19x160xf32>
    %71 = tpu.matmul %68, %70, %cst_47 {dimension_numbers = #tpu.dot_dimension_numbers<[1], [0], [0], [1], [0, 0, 1, 1], [], []>} : vector<19x167xbf16>, vector<167x160xbf16>, vector<19x160xf32> -> vector<19x160xf32>
    %72 = arith.addf %64, %71 : vector<19x160xf32>
    %73 = vector.extract_strided_slice %41 {offsets = [8, 0], sizes = [19, 167], strides = [1, 1]} : vector<28x167xf32> to vector<19x167xf32>
    %74 = vector.extract_strided_slice %41 {offsets = [9, 0], sizes = [19, 167], strides = [1, 1]} : vector<28x167xf32> to vector<19x167xf32>
    %75 = arith.maximumf %73, %74 : vector<19x167xf32>
    %76 = arith.truncf %75 : vector<19x167xf32> to vector<19x167xbf16>
    %c4_48 = arith.constant 4 : index
    %c0_49 = arith.constant 0 : index
    %c0_50 = arith.constant 0 : index
    %77 = vector.load %arg3[%c4_48, %c0_49, %c0_50] : memref<5x167x160xbf16, #tpu.memory_space<vmem>>, vector<1x167x160xbf16>
    %78 = vector.shape_cast %77 : vector<1x167x160xbf16> to vector<167x160xbf16>
    %cst_51 = arith.constant dense<0.000000e+00> : vector<19x160xf32>
    %79 = tpu.matmul %76, %78, %cst_51 {dimension_numbers = #tpu.dot_dimension_numbers<[1], [0], [0], [1], [0, 0, 1, 1], [], []>} : vector<19x167xbf16>, vector<167x160xbf16>, vector<19x160xf32> -> vector<19x160xf32>
    %80 = arith.addf %72, %79 : vector<19x160xf32>
    %c1_52 = arith.constant 1 : index
    %c0_53 = arith.constant 0 : index
    %81 = vector.load %arg6[%c1_52, %c0_53] : memref<4x168xf32, #tpu.memory_space<vmem>>, vector<1x160xf32>
    %82 = vector.broadcast %81 : vector<1x160xf32> to vector<19x160xf32>
    %83 = arith.addf %80, %82 : vector<19x160xf32>
    %cst_54 = arith.constant 0.000000e+00 : f32
    %84 = vector.broadcast %cst_54 : f32 to vector<19x160xf32>
    %85 = arith.maximumf %83, %84 : vector<19x160xf32>
    %86 = vector.extract_strided_slice %85 {offsets = [0, 0], sizes = [19, 159], strides = [1, 1]} : vector<19x160xf32> to vector<19x159xf32>
    %87 = vector.extract_strided_slice %85 {offsets = [0, 1], sizes = [19, 159], strides = [1, 1]} : vector<19x160xf32> to vector<19x159xf32>
    %88 = arith.maximumf %86, %87 : vector<19x159xf32>
    %89 = vector.extract_strided_slice %88 {offsets = [0, 0], sizes = [1, 159], strides = [1, 1]} : vector<19x159xf32> to vector<1x159xf32>
    %90 = vector.extract_strided_slice %88 {offsets = [2, 0], sizes = [1, 159], strides = [1, 1]} : vector<19x159xf32> to vector<1x159xf32>
    %91 = arith.maximumf %89, %90 : vector<1x159xf32>
    %92 = arith.truncf %91 : vector<1x159xf32> to vector<1x159xbf16>
    %c0_55 = arith.constant 0 : index
    %c0_56 = arith.constant 0 : index
    %c0_57 = arith.constant 0 : index
    %93 = vector.load %arg4[%c0_55, %c0_56, %c0_57] : memref<5x159x120xbf16, #tpu.memory_space<vmem>>, vector<1x159x120xbf16>
    %94 = vector.shape_cast %93 : vector<1x159x120xbf16> to vector<159x120xbf16>
    %cst_58 = arith.constant dense<0.000000e+00> : vector<1x120xf32>
    %95 = tpu.matmul %92, %94, %cst_58 {dimension_numbers = #tpu.dot_dimension_numbers<[1], [0], [0], [1], [0, 0, 1, 1], [], []>} : vector<1x159xbf16>, vector<159x120xbf16>, vector<1x120xf32> -> vector<1x120xf32>
    %96 = vector.extract_strided_slice %88 {offsets = [4, 0], sizes = [1, 159], strides = [1, 1]} : vector<19x159xf32> to vector<1x159xf32>
    %97 = vector.extract_strided_slice %88 {offsets = [6, 0], sizes = [1, 159], strides = [1, 1]} : vector<19x159xf32> to vector<1x159xf32>
    %98 = arith.maximumf %96, %97 : vector<1x159xf32>
    %99 = arith.truncf %98 : vector<1x159xf32> to vector<1x159xbf16>
    %c1_59 = arith.constant 1 : index
    %c0_60 = arith.constant 0 : index
    %c0_61 = arith.constant 0 : index
    %100 = vector.load %arg4[%c1_59, %c0_60, %c0_61] : memref<5x159x120xbf16, #tpu.memory_space<vmem>>, vector<1x159x120xbf16>
    %101 = vector.shape_cast %100 : vector<1x159x120xbf16> to vector<159x120xbf16>
    %cst_62 = arith.constant dense<0.000000e+00> : vector<1x120xf32>
    %102 = tpu.matmul %99, %101, %cst_62 {dimension_numbers = #tpu.dot_dimension_numbers<[1], [0], [0], [1], [0, 0, 1, 1], [], []>} : vector<1x159xbf16>, vector<159x120xbf16>, vector<1x120xf32> -> vector<1x120xf32>
    %103 = arith.addf %95, %102 : vector<1x120xf32>
    %104 = vector.extract_strided_slice %88 {offsets = [8, 0], sizes = [1, 159], strides = [1, 1]} : vector<19x159xf32> to vector<1x159xf32>
    %105 = vector.extract_strided_slice %88 {offsets = [10, 0], sizes = [1, 159], strides = [1, 1]} : vector<19x159xf32> to vector<1x159xf32>
    %106 = arith.maximumf %104, %105 : vector<1x159xf32>
    %107 = arith.truncf %106 : vector<1x159xf32> to vector<1x159xbf16>
    %c2_63 = arith.constant 2 : index
    %c0_64 = arith.constant 0 : index
    %c0_65 = arith.constant 0 : index
    %108 = vector.load %arg4[%c2_63, %c0_64, %c0_65] : memref<5x159x120xbf16, #tpu.memory_space<vmem>>, vector<1x159x120xbf16>
    %109 = vector.shape_cast %108 : vector<1x159x120xbf16> to vector<159x120xbf16>
    %cst_66 = arith.constant dense<0.000000e+00> : vector<1x120xf32>
    %110 = tpu.matmul %107, %109, %cst_66 {dimension_numbers = #tpu.dot_dimension_numbers<[1], [0], [0], [1], [0, 0, 1, 1], [], []>} : vector<1x159xbf16>, vector<159x120xbf16>, vector<1x120xf32> -> vector<1x120xf32>
    %111 = arith.addf %103, %110 : vector<1x120xf32>
    %112 = vector.extract_strided_slice %88 {offsets = [12, 0], sizes = [1, 159], strides = [1, 1]} : vector<19x159xf32> to vector<1x159xf32>
    %113 = vector.extract_strided_slice %88 {offsets = [14, 0], sizes = [1, 159], strides = [1, 1]} : vector<19x159xf32> to vector<1x159xf32>
    %114 = arith.maximumf %112, %113 : vector<1x159xf32>
    %115 = arith.truncf %114 : vector<1x159xf32> to vector<1x159xbf16>
    %c3_67 = arith.constant 3 : index
    %c0_68 = arith.constant 0 : index
    %c0_69 = arith.constant 0 : index
    %116 = vector.load %arg4[%c3_67, %c0_68, %c0_69] : memref<5x159x120xbf16, #tpu.memory_space<vmem>>, vector<1x159x120xbf16>
    %117 = vector.shape_cast %116 : vector<1x159x120xbf16> to vector<159x120xbf16>
    %cst_70 = arith.constant dense<0.000000e+00> : vector<1x120xf32>
    %118 = tpu.matmul %115, %117, %cst_70 {dimension_numbers = #tpu.dot_dimension_numbers<[1], [0], [0], [1], [0, 0, 1, 1], [], []>} : vector<1x159xbf16>, vector<159x120xbf16>, vector<1x120xf32> -> vector<1x120xf32>
    %119 = arith.addf %111, %118 : vector<1x120xf32>
    %120 = vector.extract_strided_slice %88 {offsets = [16, 0], sizes = [1, 159], strides = [1, 1]} : vector<19x159xf32> to vector<1x159xf32>
    %121 = vector.extract_strided_slice %88 {offsets = [18, 0], sizes = [1, 159], strides = [1, 1]} : vector<19x159xf32> to vector<1x159xf32>
    %122 = arith.maximumf %120, %121 : vector<1x159xf32>
    %123 = arith.truncf %122 : vector<1x159xf32> to vector<1x159xbf16>
    %c4_71 = arith.constant 4 : index
    %c0_72 = arith.constant 0 : index
    %c0_73 = arith.constant 0 : index
    %124 = vector.load %arg4[%c4_71, %c0_72, %c0_73] : memref<5x159x120xbf16, #tpu.memory_space<vmem>>, vector<1x159x120xbf16>
    %125 = vector.shape_cast %124 : vector<1x159x120xbf16> to vector<159x120xbf16>
    %cst_74 = arith.constant dense<0.000000e+00> : vector<1x120xf32>
    %126 = tpu.matmul %123, %125, %cst_74 {dimension_numbers = #tpu.dot_dimension_numbers<[1], [0], [0], [1], [0, 0, 1, 1], [], []>} : vector<1x159xbf16>, vector<159x120xbf16>, vector<1x120xf32> -> vector<1x120xf32>
    %127 = arith.addf %119, %126 : vector<1x120xf32>
    %c2_75 = arith.constant 2 : index
    %c0_76 = arith.constant 0 : index
    %128 = vector.load %arg6[%c2_75, %c0_76] : memref<4x168xf32, #tpu.memory_space<vmem>>, vector<1x120xf32>
    %129 = arith.addf %127, %128 : vector<1x120xf32>
    %cst_77 = arith.constant 0.000000e+00 : f32
    %130 = vector.broadcast %cst_77 : f32 to vector<1x120xf32>
    %131 = arith.maximumf %129, %130 : vector<1x120xf32>
    %132 = arith.truncf %131 : vector<1x120xf32> to vector<1x120xbf16>
    %c0_78 = arith.constant 0 : index
    %c0_79 = arith.constant 0 : index
    %133 = vector.load %arg5[%c0_78, %c0_79] : memref<120x32xbf16, #tpu.memory_space<vmem>>, vector<120x32xbf16>
    %cst_80 = arith.constant dense<0.000000e+00> : vector<1x32xf32>
    %134 = tpu.matmul %132, %133, %cst_80 {dimension_numbers = #tpu.dot_dimension_numbers<[1], [0], [0], [1], [0, 0, 1, 1], [], []>} : vector<1x120xbf16>, vector<120x32xbf16>, vector<1x32xf32> -> vector<1x32xf32>
    %c3_81 = arith.constant 3 : index
    %c0_82 = arith.constant 0 : index
    %135 = vector.load %arg6[%c3_81, %c0_82] : memref<4x168xf32, #tpu.memory_space<vmem>>, vector<1x32xf32>
    %136 = arith.addf %134, %135 : vector<1x32xf32>
    %cst_83 = arith.constant 0.000000e+00 : f32
    %137 = vector.broadcast %cst_83 : f32 to vector<1x32xf32>
    %138 = arith.maximumf %136, %137 : vector<1x32xf32>
    %c0_84 = arith.constant 0 : index
    %c0_85 = arith.constant 0 : index
    %c0_86 = arith.constant 0 : index
    %139 = vector.load %arg7[%c0_84, %c0_85, %c0_86] : memref<1x1x32xf32, #tpu.memory_space<vmem>>, vector<1x1x32xf32>
    %140 = vector.shape_cast %139 : vector<1x1x32xf32> to vector<1x32xf32>
    %141 = vector.shape_cast %138 : vector<1x32xf32> to vector<1x1x32xf32>
    tpu.vector_store %arg7[%c0_84, %c0_85, %c0_86], %141 {strides = array<i32>} : memref<1x1x32xf32, #tpu.memory_space<vmem>>, vector<1x1x32xf32>,
    return
  }
  func.func @transform_0(%arg0: i32) -> (i32, i32, i32) {
    %c0_i32 = arith.constant 0 : i32
    %c0_i32_0 = arith.constant 0 : i32
    %c0_i32_1 = arith.constant 0 : i32
    return %arg0, %c0_i32, %c0_i32_0 : i32, i32, i32
  }
  func.func @transform_1(%arg0: i32) -> (i32, i32, i32) {
    %c0_i32 = arith.constant 0 : i32
    %c0_i32_0 = arith.constant 0 : i32
    %c0_i32_1 = arith.constant 0 : i32
    %c0_i32_2 = arith.constant 0 : i32
    return %c0_i32, %c0_i32_0, %c0_i32_1 : i32, i32, i32
  }
  func.func @transform_2(%arg0: i32) -> (i32, i32, i32) {
    %c0_i32 = arith.constant 0 : i32
    %c0_i32_0 = arith.constant 0 : i32
    %c0_i32_1 = arith.constant 0 : i32
    %c0_i32_2 = arith.constant 0 : i32
    return %c0_i32, %c0_i32_0, %c0_i32_1 : i32, i32, i32
  }
  func.func @transform_3(%arg0: i32) -> (i32, i32, i32) {
    %c0_i32 = arith.constant 0 : i32
    %c0_i32_0 = arith.constant 0 : i32
    %c0_i32_1 = arith.constant 0 : i32
    %c0_i32_2 = arith.constant 0 : i32
    return %c0_i32, %c0_i32_0, %c0_i32_1 : i32, i32, i32
  }
  func.func @transform_4(%arg0: i32) -> (i32, i32) {
    %c0_i32 = arith.constant 0 : i32
    %c0_i32_0 = arith.constant 0 : i32
    %c0_i32_1 = arith.constant 0 : i32
    return %c0_i32, %c0_i32_0 : i32, i32
  }
  func.func @transform_5(%arg0: i32) -> (i32, i32) {
    %c0_i32 = arith.constant 0 : i32
    %c0_i32_0 = arith.constant 0 : i32
    %c0_i32_1 = arith.constant 0 : i32
    return %c0_i32, %c0_i32_0 : i32, i32
  }
  func.func @transform_6(%arg0: i32) -> (i32, i32, i32) {
    %c0_i32 = arith.constant 0 : i32
    %c0_i32_0 = arith.constant 0 : i32
    %c0_i32_1 = arith.constant 0 : i32
    return %arg0, %c0_i32, %c0_i32_0 : i32, i32, i32
  }
}

</mosaic_0001>

<bundles_post_ra>
// kernel: classifier_forward.1
= control target key start
LH: loop header
LB: loop body
LE: loop exit
PB: predicated region body
PF: predicated region fallthrough
CT: control target
= control target key end

     0   :  { %11 = vsyncpa [#allocation3], 0  ;;  %s4597_s0 = inlined_call_operand.vmem [shape: f32[2,32,32], index: 0, kind: input, shape index: {}]   ;;  %s4598_s1 = inlined_call_operand.vmem [shape: bf16[5,32,168], index: 1, kind: input, shape index: {}]   ;;  %s4599_s2 = inlined_call_operand.vmem [shape: bf16[5,167,160], index: 2, kind: input, shape index: {}]   ;;  %s4600_s3 = inlined_call_operand.vmem [shape: bf16[5,159,120], index: 3, kind: input, shape index: {}]   ;;  %s4601_s4 = inlined_call_operand.vmem [shape: bf16[120,32], index: 4, kind: input, shape index: {}]   ;;  %s4602_s5 = inlined_call_operand.vmem [shape: f32[4,168], index: 5, kind: input, shape index: {}]   ;;  %s4603_s6 = inlined_call_operand.hbm [shape: f32[2,1,32], index: 6, kind: output, shape index: {}]  }
   0x1   :  { %13 = vsyncpa [#allocation3 + $0x1], 0  ;;  %s3640_s21 = smov 0   ;;  %s3642_s22 = smov 0  }
   0x2   :  { %s3644_s23 = smov 0   ;;  %s3646_s24 = smov 0  }
   0x3 LB: > { %s3661_s25 = sadd.s32 4294967295, %s3597_s24   ;;  %s2772_s26 = sadd.s32 4294967294, %s3597_s24   ;;  %s3597_s24 = sphi %s3646_s24, %s4609_s24   ;;  %s3593_s23 = sphi %s3644_s23, %s4608_s23   ;;  %s3589_s22 = sphi %s3642_s22, %s4607_s22   ;;  %s3585_s21 = sphi %s3640_s21, %s4606_s21  }
   0x4   : > { %s3665_s27 = sadd.s32 1, %s3597_s24   ;;  %s157_s28 = sadd.s32 1, %s3593_s23 }
   0x5   : > { %s154_s29 = ssub.s32 %s3597_s24, %s3665_s27  ;;  %p167_p0 = scmp.ne.s32.totalorder %s3593_s23, %s3589_s22 }
   0x6   : > { %p155_p1 = scmp.eq.s32.totalorder %s154_s29, 0  ;;  %p168_p2 = scmp.eq.s32.totalorder %s3661_s25, 1 }
   0x7   : > { %p173_p3 = scmp.ne.s32.totalorder %s3589_s22, %s3585_s21  ;;  %p174_p4 = scmp.eq.s32.totalorder %s2772_s26, 1 }
   0x8   : > { %s3676_s30 = scalar_select %p155_p1, %s3593_s23, %s157_s28  }
   0x9   : > { %p3678_p5 = por %p168_p2, %p167_p0  ;;  %p3682_p6 = por %p174_p4, %p173_p3 }
   0xa   : > { %p2775_p7 = scmp.ge.s32.totalorder %s3597_s24, 1  ;;  %p215_p8 = scmp.lt.s32.totalorder %s3597_s24, 3 }
   0xc   : > { %p216_p9 = pnand %p2775_p7, %p215_p8 }
   0xd   : > { %p244_p10 = scmp.lt.s32.totalorder (!%p216_p9), %s3661_s25, 1  ;;  %s3601_s11 = smov (!%p216_p9), 127  }
   0xe   : > { %219 = sbr.rel (%p216_p9) target bundleno = 1321 (0x529), region = 44  ;;  %s242_s9 = sand.u32 (!%p216_p9), 1, %s3589_s22  }
   0xf   : > { %s3173_s14 = sshll.u32 (!%p216_p9), %s3661_s25, 4  ;;  %s243_s15 = scalar_lea.vmem (!%p216_p9), [#allocation2], %s242_s9 }
  0x10   : > { %s2717_s16 = sshll.u32 (!%p216_p9), %s243_s15, 4  ;;  %s4556_s18 = scalar_lea.hbm (!%p216_p9), %s4603_s6, %s3173_s14  ;;  %s4558_s16 = int_to_ptr.vmem [resolvable:$true] %s2717_s16 }
  0x11   : > { %s3537_s19 = scalar_lea.vmem (!%p216_p9), %s4558_s16, 16  ;;  %s3604_s20 = smov (!%p216_p9), [#allocation2]  }
  0x12   : > { %p3538_p11 = scmp.ne.s32.totalorder (!%p216_p9), %s4558_s16, %s3537_s19  ;;  %s3541_s26 = sshll.u32 (!%p216_p9), %s3604_s20, 4  ;;  %s3542_s26 = int_to_ptr.vmem [resolvable:$false] %s3541_s26 }
  0x13   : > { %v3289_v0 = vld [vmem:[%s4598_s1 + $0x34] ss:$8 sps:$4 sm:$0xff]   ;;  %v3291_v1 = vld [vmem:[%s4598_s1 + $0x30] ss:$8 sps:$4 sm:$0xff]   ;;  %v3599_v2 = vmov 0   ;;  %s245_s17 = scalar_select %p244_p10, %s3661_s25, 1 }
  0x14   : > { %330 = vmatprep.mubr.bf16.mxu0 %v3599_v2  ;;  %419 = vmatprep.mubr.bf16.mxu1 %v3599_v2  ;;  %v3292_v3 = vld [vmem:[%s4598_s1 + $0x24] ss:$8 sps:$4 sm:$0xff]   ;;  %v3294_v4 = vld [vmem:[%s4598_s1 + $0x20] ss:$8 sps:$4 sm:$0xff]   ;;  %v3295_v5 = vld [vmem:[%s4598_s1 + $0x10] ss:$8 sps:$4 sm:$0xff]   ;;  %p3539_p12 = pnand %p3538_p11, %p3678_p5  ;;  %p3544_p0 = scmp.lt.s32.totalorder %s4558_s16, %s3542_s26 }
  0x15   : > { %310 = vmatprep.subr.bf16.mxu0 %v3289_v0  ;;  %v3297_v6 = vld [vmem:[%s4598_s1 + $0x14] ss:$8 sps:$4 sm:$0xff]   ;;  %s3176_s28 = sshll.u32 %s245_s17, 5  ;;  %v3298_v7 = vld [vmem:[%s4598_s1 + $0x4] ss:$8 sps:$4 sm:$0xff]   ;;  %vm291_vm0 = vcmask 261120  }
  0x16   : > { %311 = vmatpush1.bf16.msra.mxu0 %v3291_v1  ;;  %s3716_s12 = scalar_lea.vmem %s4597_s0, %s3176_s28  ;;  %3206 = vmatprep.subr.bf16.mxu1 %v3297_v6  ;;  %v3300_v10 = vld [vmem:[%s4598_s1] ss:$8 sps:$4 sm:$0xff]   ;;  %v3304_v15 = vld [vmem:[%s4598_s1 + $0x70] ss:$8 sps:$4 sm:$0xff]   ;;  %v3306_v16 = vld [vmem:[%s4598_s1 + $0x74] ss:$8 sps:$4 sm:$0xff]   ;;  %p3540_p13 = pneg %p3539_p12 }
  0x17   : > { %312 = vmatprep.subr.bf16.mxu0 %v3292_v3  ;;  %v260_v8 = vld [vmem:[%s3716_s12 + $0x1] sm:$0xff]  ;;  %v261_v9 = vld [vmem:[%s3716_s12 + $0x9] sm:$0xff]  ;;  %3208 = vmatpush1.bf16.msra.mxu1 %v3295_v5  ;;  %v253_v13 = vld [vmem:[%s3716_s12 + $0x18] sm:$0xf]  ;;  %vm998_vm1 = vcmask 1042432   ;;  %vm999_vm2 = vcmask 1043456  }
  0x18   : > { %v264_v11 = vpack.c.bf16 %v261_v9, %v260_v8  ;;  %3207 = vmatprep.subr.bf16.mxu1 %v3298_v7  ;;  %v252_v12 = vld [vmem:[%s3716_s12 + $0x10] sm:$0xff]  ;;  %v263_v18 = vld [vmem:[%s3716_s12 + $0x19] sm:$0xf]  ;;  %v3312_v20 = vld [vmem:[%s4598_s1 + $0x64] ss:$8 sps:$4 sm:$0xff]   ;;  %vm776_vm3 = vcmask 1039360  }
  0x19   : > { %v255_v14 = vpack.c.bf16 %v253_v13, %v252_v12  ;;  %v262_v17 = vld [vmem:[%s3716_s12 + $0x11] sm:$0xff]  ;;  %v3310_v22 = vld [vmem:[%s4598_s1 + $0x60] ss:$8 sps:$4 sm:$0xff]   ;;  %v531_v29 = vld [vmem:[%s3716_s12 + $0x1b] sm:$0xf]  ;;  %vm803_vm4 = vcmask 1046528  }
  0x1a   : > { %313 = vmatpush1.bf16.msra.mxu0 %v3294_v4  ;;  %v3303_v19 = vld [vmem:[%s4598_s1 + $0x54] ss:$8 sps:$4 sm:$0xff]   ;;  %v265_v21 = vpack.c.bf16 %v263_v18, %v262_v17  ;;  %v528_v23 = vld [vmem:[%s3716_s12 + $0x3] sm:$0xff]  ;;  %v529_v24 = vld [vmem:[%s3716_s12 + $0xb] sm:$0xff]  ;;  %vm991_vm5 = vcmask 318464   ;;  %vm1472_vm6 = vcmask 1044480  }
  0x1b   : > { %389 = vmatprep.subr.bf16.mxu0 %v3297_v6  ;;  %3209 = vmatpush1.bf16.msra.mxu1 %v3300_v10  ;;  %v532_v25 = vpack.c.bf16 %v529_v24, %v528_v23  ;;  %v250_v26 = vld [vmem:[%s3716_s12] sm:$0xff]  ;;  %v251_v27 = vld [vmem:[%s3716_s12 + $0x8] sm:$0xff]  ;;  %v530_v28 = vld [vmem:[%s3716_s12 + $0x13] sm:$0xff]  ;;  %vm1249_vm7 = vcmask 1045504   ;;  %vm2032_vm8 = vcmask 1047552   ;;  %vm2028_vm9 = vcmask 252928  }
  0x1c   : > { %577 = vmatprep.subr.bf16.mxu1 %v3306_v16  ;;  %v3301_v30 = vld [vmem:[%s4598_s1 + $0x50] ss:$8 sps:$4 sm:$0xff]   ;;  %v254_v31 = vpack.c.bf16 %v251_v27, %v250_v26  ;;  %v3309_v32 = vld [vmem:[%s4598_s1 + $0x44] ss:$8 sps:$4 sm:$0xff]   ;;  %v3307_v33 = vld [vmem:[%s4598_s1 + $0x40] ss:$8 sps:$4 sm:$0xff]   ;;  %v533_v36 = vpack.c.bf16 %v531_v29, %v530_v28 }
  0x1d   : > { %2786 = vmatmul.mubr.msk.bf16.vlgmr.msra.gmra.mxu0 %vm291_vm0, %v264_v11  ;;  %v430_v34 = vld [vmem:[%s3716_s12 + $0x2] sm:$0xff]  ;;  %v431_v35 = vld [vmem:[%s3716_s12 + $0xa] sm:$0xff]  ;;  %v3315_v37 = vld [vmem:[%s4598_s1 + $0x94] ss:$8 sps:$4 sm:$0xff]   ;;  %vm3603_vm10 = vmmov 0   ;;  %vm2654_vm11 = vcmask 982016  }
  0x1e   : > { %390 = vmatpush1.bf16.msra.mxu0 %v3295_v5  ;;  %340 = vmatprep.mubr.bf16.mxu0 %v3599_v2  ;;  %v3313_v38 = vld [vmem:[%s4598_s1 + $0x90] ss:$8 sps:$4 sm:$0xff]   ;;  %v434_v39 = vpack.c.bf16 %v431_v35, %v430_v34  ;;  %v3318_v40 = vld [vmem:[%s4598_s1 + $0x84] ss:$8 sps:$4 sm:$0xff]   ;;  %v3316_v43 = vld [vmem:[%s4598_s1 + $0x80] ss:$8 sps:$4 sm:$0xff]   ;;  %v726_v34 = vlaneseq }
  0x1f   : > { %391 = vmatprep.subr.bf16.mxu0 %v3298_v7  ;;  %2793 = vmatmul.mubr.msk.bf16.vlgmr.msra.gmra.mxu1 %vm291_vm0, %v255_v14  ;;  %v432_v41 = vld [vmem:[%s3716_s12 + $0x12] sm:$0xff]  ;;  %v433_v42 = vld [vmem:[%s3716_s12 + $0x1a] sm:$0xf]  ;;  %v626_v45 = vld [vmem:[%s3716_s12 + $0x4] sm:$0xff]  ;;  %vm2702_vm12 = vcmask 253952   ;;  %s2705_s25 = scalar_lea.sflag [#allocation3], %s242_s9 }
  0x20   : > { %578 = vmatpush1.bf16.msra.mxu1 %v3304_v15  ;;  %597 = vmatprep.mubr.bf16.mxu1 %v3599_v2  ;;  %v435_v44 = vpack.c.bf16 %v433_v42, %v432_v41  ;;  %v627_v46 = vld [vmem:[%s3716_s12 + $0xc] sm:$0xff]  ;;  %v628_v48 = vld [vmem:[%s3716_s12 + $0x14] sm:$0xff]  ;;  %v629_v49 = vld [vmem:[%s3716_s12 + $0x1c] sm:$0xf]  ;;  %s3543_s28 = scalar_lea.vmem %s3542_s26, 32 }
  0x21   : > { %579 = vmatprep.subr.bf16.mxu1 %v3312_v20  ;;  %v630_v47 = vpack.c.bf16 %v627_v46, %v626_v45  ;;  %v631_v50 = vpack.c.bf16 %v629_v49, %v628_v48  ;;  %v3319_v51 = vld [vmem:[%s4599_s2 + $0x70] ss:$8 sps:$4 sm:$0xff]   ;;  %v3321_v52 = vld [vmem:[%s4599_s2 + $0x74] ss:$8 sps:$4 sm:$0xff]   ;;  %v3327_v55 = vld [vmem:[%s4599_s2 + $0x64] ss:$8 sps:$4 sm:$0xff]   ;;  %p3545_p1 = scmp.lt.s32.totalorder %s3543_s28, %s3537_s19 }
  0x22   : > { %392 = vmatpush1.bf16.msra.mxu0 %v3300_v10  ;;  %v3322_v53 = vld [vmem:[%s4599_s2 + $0x118] ss:$8 sps:$4 sm:$0xff]   ;;  %v3324_v54 = vld [vmem:[%s4599_s2 + $0x11c] ss:$8 sps:$4 sm:$0xff]   ;;  %v3330_v56 = vld [vmem:[%s4599_s2 + $0x10c] ss:$8 sps:$4 sm:$0xff]  }
  0x23   : > { %479 = vmatprep.subr.bf16.mxu0 %v3303_v19  ;;  %v3325_v57 = vld [vmem:[%s4599_s2 + $0x60] ss:$8 sps:$4 sm:$0xff]   ;;  %v3333_v59 = vld [vmem:[%s4599_s2 + $0x54] ss:$8 sps:$4 sm:$0xff]   ;;  %v3331_v61 = vld [vmem:[%s4599_s2 + $0x50] ss:$8 sps:$4 sm:$0xff]   ;;  %p3546_p2 = por %p3545_p1, %p3544_p0 }
  0x24   : > { %580 = vmatpush1.bf16.msra.mxu1 %v3310_v22  ;;  %v3328_v58 = vld [vmem:[%s4599_s2 + $0x108] ss:$8 sps:$4 sm:$0xff]   ;;  %v3336_v60 = vld [vmem:[%s4599_s2 + $0xfc] ss:$8 sps:$4 sm:$0xff]   ;;  %v3334_v62 = vld [vmem:[%s4599_s2 + $0xf8] ss:$8 sps:$4 sm:$0xff]  }
  0x25   : > { %2787 = vmatmul.mubr.msk.bf16.gmra.mxu0 %vm291_vm0, %v265_v21  ;;  %1008 = vmatprep.subr.bf16.mxu1 %v3324_v54  ;;  %v3339_v63 = vld [vmem:[%s4599_s2 + $0x44] ss:$8 sps:$4 sm:$0xff]   ;;  %v3337_v1 = vld [vmem:[%s4599_s2 + $0x40] ss:$8 sps:$4 sm:$0xff]   ;;  %v3345_v4 = vld [vmem:[%s4599_s2 + $0x34] ss:$8 sps:$4 sm:$0xff]   ;;  %p3547_p3 = pnand %p3546_p2, %p3540_p13 }
  0x26   : > { %409 = vmatprep.mubr.bf16.mxu0 %v3599_v2  ;;  %v3342_v0 = vld [vmem:[%s4599_s2 + $0xec] ss:$8 sps:$4 sm:$0xff]   ;;  %v3340_v3 = vld [vmem:[%s4599_s2 + $0xe8] ss:$8 sps:$4 sm:$0xff]   ;;  %v3348_v5 = vld [vmem:[%s4599_s2 + $0xdc] ss:$8 sps:$4 sm:$0xff]  }
  0x27   : > { %2812 = vmatmul.mubr.msk.bf16.vlgmr.msra.gmra.mxu1 %vm291_vm0, %v532_v25  ;;  %v3343_v6 = vld [vmem:[%s4599_s2 + $0x30] ss:$8 sps:$4 sm:$0xff]   ;;  %v3351_v8 = vld [vmem:[%s4599_s2 + $0x24] ss:$8 sps:$4 sm:$0xff]   ;;  %v3349_v10 = vld [vmem:[%s4599_s2 + $0x20] ss:$8 sps:$4 sm:$0xff]  }
  0x28   : > { %607 = vmatprep.mubr.bf16.mxu1 %v3599_v2  ;;  %1009 = vmatpush1.bf16.msra.mxu1 %v3322_v53  ;;  %v3346_v7 = vld [vmem:[%s4599_s2 + $0xd8] ss:$8 sps:$4 sm:$0xff]   ;;  %v3354_v9 = vld [vmem:[%s4599_s2 + $0xcc] ss:$8 sps:$4 sm:$0xff]   ;;  %v3352_v11 = vld [vmem:[%s4599_s2 + $0xc8] ss:$8 sps:$4 sm:$0xff]  }
  0x29   : > { %1010 = vmatprep.subr.bf16.mxu1 %v3330_v56  ;;  %v3357_v12 = vld [vmem:[%s4599_s2 + $0x14] ss:$8 sps:$4 sm:$0xff]   ;;  %v3355_v13 = vld [vmem:[%s4599_s2 + $0x10] ss:$8 sps:$4 sm:$0xff]  }
  0x2a   : > { %v3360_v56 = vld [vmem:[%s4599_s2 + $0xbc] ss:$8 sps:$4 sm:$0xff]  }
  0x2c   : > { %1011 = vmatpush1.bf16.msra.mxu1 %v3328_v58 }
  0x2d   : > { %2792 = vmatmul.mubr.msk.bf16.vlgmr.msra.gmra.mxu0 %vm291_vm0, %v254_v31  ;;  %1012 = vmatprep.subr.bf16.mxu1 %v3336_v60 }
  0x2e   : > { %480 = vmatpush1.bf16.msra.mxu0 %v3301_v30  ;;  %499 = vmatprep.mubr.bf16.mxu0 %v3599_v2 }
  0x2f   : > { %481 = vmatprep.subr.bf16.mxu0 %v3309_v32  ;;  %2813 = vmatmul.mubr.msk.bf16.gmra.mxu1 %vm291_vm0, %v533_v36 }
  0x30   : > { %1013 = vmatpush1.bf16.msra.mxu1 %v3334_v62  ;;  %v3363_v62 = vld [vmem:[%s4599_s2 + $0x4] ss:$8 sps:$4 sm:$0xff]  }
  0x31   : > { %1014 = vmatprep.subr.bf16.mxu1 %v3342_v0 }
  0x32   : > { %482 = vmatpush1.bf16.msra.mxu0 %v3307_v33 }
  0x33   : > { %675 = vmatprep.subr.bf16.mxu0 %v3315_v37 }
  0x34   : > { %1015 = vmatpush1.bf16.msra.mxu1 %v3340_v3  ;;  %v3361_v3 = vld [vmem:[%s4599_s2] ss:$8 sps:$4 sm:$0xff]  }
  0x35   : > { %2802 = vmatmul.mubr.msk.bf16.vlgmr.msra.gmra.mxu0 %vm291_vm0, %v434_v39  ;;  %1016 = vmatprep.subr.bf16.mxu1 %v3348_v5 }
  0x36   : > { %676 = vmatpush1.bf16.msra.mxu0 %v3313_v38  ;;  %509 = vmatprep.mubr.bf16.mxu0 %v3599_v2  ;;  %v3873_v38 = vshrl.u32 %v726_v34, 7 }
  0x37   : > { %677 = vmatprep.subr.bf16.mxu0 %v3318_v40 }
  0x38   : > { %1017 = vmatpush1.bf16.msra.mxu1 %v3346_v7  ;;  %v732_v45 = vsub.s32 1, %v3873_v38 }
  0x39   : > { %1018 = vmatprep.subr.bf16.mxu1 %v3354_v9 }
  0x3a   : > { %678 = vmatpush1.bf16.msra.mxu0 %v3316_v43 }
  0x3b   : > { %1176 = vmatprep.subr.bf16.mxu0 %v3321_v52 }
  0x3c   : > { %1019 = vmatpush1.bf16.msra.mxu1 %v3352_v11 }
  0x3d   : > { %2803 = vmatmul.mubr.msk.bf16.gmra.mxu0 %vm291_vm0, %v435_v44  ;;  %v728_v44 = vsub.s32 0, %v3873_v38  ;;  %1020 = vmatprep.subr.bf16.mxu1 %v3360_v56 }
  0x3e   : > { %695 = vmatprep.mubr.bf16.mxu0 %v3599_v2 }
  0x45   : > { %2822 = vmatmul.mubr.msk.bf16.vlgmr.msra.gmra.mxu0 %vm291_vm0, %v630_v47  ;;  %v724_v47 = vld [vmem:[%s4602_s5] ss:$4 sm:$0x3] }
  0x46   : > { %705 = vmatprep.mubr.bf16.mxu0 %v3599_v2  ;;  %1177 = vmatpush1.bf16.msra.mxu0 %v3319_v51  ;;  %v3884_v54 = vrot.slane %v724_v47, %v728_v44 }
  0x47   : > { %1178 = vmatprep.subr.bf16.mxu0 %v3327_v55  ;;  %v3888_v55 = vrot.slane %v724_v47, %v732_v45 }
  0x4a   : > { %1179 = vmatpush1.bf16.msra.mxu0 %v3325_v57 }
  0x4b   : > { %1180 = vmatprep.subr.bf16.mxu0 %v3333_v59 }
  0x4d   : > { %2823 = vmatmul.mubr.msk.bf16.gmra.mxu0 %vm291_vm0, %v631_v50 }
  0x4e   : > { %1181 = vmatpush1.bf16.msra.mxu0 %v3331_v61  ;;  %v3358_v61 = vld [vmem:[%s4599_s2 + $0xb8] ss:$8 sps:$4 sm:$0xff]  }
  0x4f   : > { %1182 = vmatprep.subr.bf16.mxu0 %v3339_v63  ;;  %1021 = vmatpush1.bf16.msra.mxu1 %v3358_v61 }
  0x52   : > { %1183 = vmatpush1.bf16.msra.mxu0 %v3337_v1 }
  0x53   : > { %1184 = vmatprep.subr.bf16.mxu0 %v3345_v4  ;;  %v850_v4 = vld [vmem:[%s4599_s2 + $0xa0] sm:$0xff] }
  0x56   : > { %1185 = vmatpush1.bf16.msra.mxu0 %v3343_v6 }
  0x57   : > { %1186 = vmatprep.subr.bf16.mxu0 %v3351_v8  ;;  %v3600_v8 = vmov 65535  }
  0x58   : > { %v1000_v9 = vsel %vm998_vm1, 4294967295, %v3600_v8 }
  0x5a   : > { %1187 = vmatpush1.bf16.msra.mxu0 %v3349_v10 }
  0x5b   : > { %1188 = vmatprep.subr.bf16.mxu0 %v3357_v12  ;;  %v3366_v12 = vld [vmem:[%s4599_s2 + $0xac] ss:$8 sps:$4 sm:$0xff]  }
  0x5c   : > { %1022 = vmatprep.subr.bf16.mxu1 %v3366_v12 }
  0x5e   : > { %1189 = vmatpush1.bf16.msra.mxu0 %v3355_v13  ;;  %v3910_v13 = vsel %vm999_vm2, %v1000_v9, 0  ;;  %v3382_v9 = vld [vmem:[%s4599_s2 + $0x12c] ss:$8 sps:$4 sm:$0xff]  }
  0x5f   : > { %1190 = vmatprep.subr.bf16.mxu0 %v3363_v62  ;;  %v3374_v62 = vld [vmem:[%s4599_s2 + $0x138] ss:$8 sps:$4 sm:$0xff]  }
  0x62   : > { %1191 = vmatpush1.bf16.msra.mxu0 %v3361_v3  ;;  %v3377_v3 = vld [vmem:[%s4599_s2 + $0x80] ss:$8 sps:$4 sm:$0xff]  }
  0xdd   : > { %v332_v14 = vpop.f32.mrf.mxu0 }
  0xdf   : > { %v334_v15 = vpop.f32.mrf.mxu0  ;;  %v421_v18 = vpop.f32.mrf.mxu1 }
  0xe1   : > { %v336_v16 = vpop.f32.mrf.mxu0  ;;  %v423_v21 = vpop.f32.mrf.mxu1 }
  0xe3   : > { %v338_v17 = vpop.f32.mrf.mxu0  ;;  %v425_v24 = vpop.f32.mrf.mxu1 }
  0xe5   : > { %v342_v19 = vpop.f32.mrf.mxu0  ;;  %v427_v27 = vpop.f32.mrf.mxu1 }
  0xe6   : > { %v422_v52 = vadd.f32 %v421_v18, %v342_v19 }
  0xe7   : > { %v344_v20 = vpop.f32.mrf.mxu0  ;;  %v599_v29 = vpop.f32.mrf.mxu1 }
  0xe8   : > { %v424_v57 = vadd.f32 %v423_v21, %v344_v20  ;;  %v3364_v20 = vld [vmem:[%s4599_s2 + $0xa8] ss:$8 sps:$4 sm:$0xff]  }
  0xe9   : > { %v346_v22 = vpop.f32.mrf.mxu0  ;;  %v601_v32 = vpop.f32.mrf.mxu1  ;;  %v2844_v21 = vld [vmem:[%s4599_s2 + $0x148] sm:$0xff]  ;;  %1023 = vmatpush1.bf16.msra.mxu1 %v3364_v20 }
  0xea   : > { %v426_v63 = vadd.f32 %v425_v24, %v346_v22 }
  0xeb   : > { %v348_v23 = vpop.f32.mrf.mxu0  ;;  %v603_v36 = vpop.f32.mrf.mxu1 }
  0xed   : > { %v411_v25 = vpop.f32.mrf.mxu0  ;;  %v605_v41 = vpop.f32.mrf.mxu1 }
  0xee   : > { %v412_v40 = vadd.f32 %v411_v25, %v332_v14  ;;  %v2889_v14 = vcombine.low %v850_v4, %v850_v4 }
  0xef   : > { %v413_v26 = vpop.f32.mrf.mxu0  ;;  %v609_v51 = vpop.f32.mrf.mxu1 }
  0xf0   : > { %v414_v42 = vadd.f32 %v413_v26, %v334_v15  ;;  %v2890_v15 = vcombine.high %v850_v4, %v850_v4  ;;  %v2866_v26 = vcombine.high %v2844_v21, %v2844_v21 }
  0xf1   : > { %v415_v28 = vpop.f32.mrf.mxu0  ;;  %v611_v6 = vpop.f32.mrf.mxu1 }
  0xf2   : > { %v416_v50 = vadd.f32 %v415_v28, %v336_v16  ;;  %v428_v16 = vadd.f32 %v427_v27, %v348_v23  ;;  %v1174_v25 = vand.u32 %v2890_v15, %v3910_v13  ;;  %v1171_v23 = vand.u32 %v2889_v14, %v3910_v13  ;;  %v3380_v15 = vld [vmem:[%s4599_s2 + $0x128] ss:$8 sps:$4 sm:$0xff]  }
  0xf3   : > { %v417_v30 = vpop.f32.mrf.mxu0  ;;  %v613_v28 = vpop.f32.mrf.mxu1 }
  0xf4   : > { %v418_v58 = vadd.f32 %v417_v30, %v338_v17  ;;  %1202 = vmatprep.subr.bf16.mxu0 %v1174_v25 }
  0xf5   : > { %v501_v31 = vpop.f32.mrf.mxu0  ;;  %1203 = vmatpush2.bf16.msra.mxu0 %v1171_v23 }
  0xf6   : > { %v520_v46 = vadd.f32 %v501_v31, %v412_v40  ;;  %v2865_v31 = vcombine.low %v2844_v21, %v2844_v21  ;;  %v3388_v21 = vld [vmem:[%s4599_s2 + $0x1c4] ss:$8 sps:$4 sm:$0xff]  }
  0xf7   : > { %v503_v33 = vpop.f32.mrf.mxu0 }
  0xf8   : > { %v521_v48 = vadd.f32 %v503_v33, %v414_v42  ;;  %v618_v59 = vadd.f32 %v599_v29, %v520_v46  ;;  %v3373_v42 = vld [vmem:[%s4599_s2 + $0x94] ss:$8 sps:$4 sm:$0xff]  }
  0xf9   : > { %v505_v35 = vpop.f32.mrf.mxu0  ;;  %1204 = vmatprep.subr.bf16.mxu0 %v3373_v42 }
  0xfa   : > { %v522_v60 = vadd.f32 %v505_v35, %v416_v50  ;;  %v619_v0 = vadd.f32 %v601_v32, %v521_v48  ;;  %v3371_v48 = vld [vmem:[%s4599_s2 + $0x90] ss:$8 sps:$4 sm:$0xff]  }
  0xfb   : > { %v507_v37 = vpop.f32.mrf.mxu0  ;;  %1205 = vmatpush2.bf16.msra.mxu0 %v3371_v48 }
  0xfc   : > { %v523_v5 = vadd.f32 %v507_v37, %v418_v58  ;;  %v620_v17 = vadd.f32 %v603_v36, %v522_v60  ;;  %v1006_v36 = vand.u32 %v2866_v26, %v3910_v13 }
  0xfd   : > { %v511_v39 = vpop.f32.mrf.mxu0 }
  0xfe   : > { %v524_v10 = vadd.f32 %v511_v39, %v422_v52  ;;  %v621_v27 = vadd.f32 %v605_v41, %v523_v5  ;;  %v1003_v41 = vand.u32 %v2865_v31, %v3910_v13  ;;  %1034 = vmatprep.subr.bf16.mxu1 %v1006_v36 }
  0xff   : > { %v513_v43 = vpop.f32.mrf.mxu0 }
 0x100   : > { %v525_v22 = vadd.f32 %v513_v43, %v424_v57  ;;  %v622_v32 = vadd.f32 %v609_v51, %v524_v10  ;;  %1035 = vmatpush2.bf16.msra.mxu1 %v1003_v41 }
 0x101   : > { %v515_v49 = vpop.f32.mrf.mxu0 }
 0x102   : > { %v526_v33 = vadd.f32 %v515_v49, %v426_v63  ;;  %v623_v43 = vadd.f32 %v611_v6, %v525_v22  ;;  %v615_v49 = vpop.f32.mrf.mxu1  ;;  %v3379_v63 = vld [vmem:[%s4599_s2 + $0x84] ss:$8 sps:$4 sm:$0xff]  }
 0x103   : > { %v3880_v53 = vpop.f32.mrf.mxu0  ;;  %1206 = vmatprep.subr.bf16.mxu0 %v3379_v63 }
 0x104   : > { %v527_v46 = vadd.f32 %v3880_v53, %v428_v16  ;;  %v624_v56 = vadd.f32 %v613_v28, %v526_v33  ;;  %v3376_v53 = vld [vmem:[%s4599_s2 + $0x13c] ss:$8 sps:$4 sm:$0xff]   ;;  %1207 = vmatpush2.bf16.msra.mxu0 %v3377_v3  ;;  %v3385_v16 = vld [vmem:[%s4599_s2 + $0x26c] ss:$8 sps:$4 sm:$0xff]  }
 0x105   : > { %v697_v1 = vpop.f32.mrf.mxu0  ;;  %1036 = vmatprep.subr.bf16.mxu1 %v3376_v53  ;;  %1598 = vmatprep.subr.bf16.mxu0 %v3385_v16  ;;  %v3386_v16 = vld [vmem:[%s4599_s2 + $0x1c0] ss:$8 sps:$4 sm:$0xff]  }
 0x106   : > { %v716_v7 = vadd.f32 %v697_v1, %v618_v59  ;;  %1037 = vmatpush2.bf16.msra.mxu1 %v3374_v62 }
 0x107   : > { %v699_v11 = vpop.f32.mrf.mxu0  ;;  %1038 = vmatprep.subr.bf16.mxu1 %v3382_v9 }
 0x108   : > { %v3913_v18 = vadd.f32 %v3884_v54, %v716_v7  ;;  %v717_v19 = vadd.f32 %v699_v11, %v619_v0  ;;  %v625_v0 = vadd.f32 %v615_v49, %v527_v46 }
 0x109   : > { %v701_v24 = vpop.f32.mrf.mxu0 }
 0x10a   : > { %v3924_v29 = vadd.f32 %v3888_v55, %v717_v19  ;;  %v718_v30 = vadd.f32 %v701_v24, %v620_v17  ;;  %v744_v34 = vmax.f32 %v3913_v18, 0.0  ;;  %1039 = vmatpush2.bf16.msra.mxu1 %v3380_v15 }
 0x10b   : > { %v703_v35 = vpop.f32.mrf.mxu0  ;;  %1375 = vmatprep.subr.bf16.mxu1 %v3388_v21  ;;  %v3389_v21 = vld [vmem:[%s4599_s2 + $0x258] ss:$8 sps:$4 sm:$0xff]  }
 0x10c   : > { %v745_v37 = vmax.f32 %v3924_v29, 0.0  ;;  %v3930_v39 = vadd.f32 %v3884_v54, %v718_v30  ;;  %v719_v40 = vadd.f32 %v703_v35, %v621_v27 }
 0x10d   : > { %v707_v47 = vpop.f32.mrf.mxu0 }
 0x10e   : > { %v739_v50 = vadd.f32 %v3888_v55, %v719_v40  ;;  %v720_v51 = vadd.f32 %v707_v47, %v622_v32  ;;  %v3254_v52 = vpack.i.bf16 %v745_v37, %v744_v34  ;;  %v746_v58 = vmax.f32 %v3930_v39, 0.0 }
 0x10f   : > { %v709_v57 = vpop.f32.mrf.mxu0 }
 0x110   : > { %v747_v59 = vmax.f32 %v739_v50, 0.0  ;;  %v740_v60 = vadd.f32 %v3884_v54, %v720_v51  ;;  %v721_v61 = vadd.f32 %v709_v57, %v623_v43  ;;  %3255 = vrot.lane.b32.xlu0 %v3254_v52, %s3601_s11 }
 0x111   : > { %v711_v1 = vpop.f32.mrf.mxu0 }
 0x112   : > { %v741_v4 = vadd.f32 %v3888_v55, %v721_v61  ;;  %v722_v5 = vadd.f32 %v711_v1, %v624_v56  ;;  %v3259_v6 = vpack.i.bf16 %v747_v59, %v746_v58  ;;  %v748_v10 = vmax.f32 %v740_v60, 0.0 }
 0x113   : > { %v713_v7 = vpop.f32.mrf.mxu0 }
 0x114   : > { %v749_v11 = vmax.f32 %v741_v4, 0.0  ;;  %v3965_v12 = vadd.f32 %v3884_v54, %v722_v5  ;;  %v723_v14 = vadd.f32 %v713_v7, %v625_v0  ;;  %3260 = vrot.lane.b32.xlu0 %v3259_v6, %s3601_s11  ;;  %v3383_v4 = vld [vmem:[%s4599_s2 + $0x268] ss:$8 sps:$4 sm:$0xff]  }
 0x116   : > { %v743_v17 = vadd.f32 %v3888_v55, %v723_v14  ;;  %v3264_v19 = vpack.i.bf16 %v749_v11, %v748_v10  ;;  %v750_v54 = vmax.f32 %v3965_v12, 0.0  ;;  %v3427_v12 = vld [vmem:[%s4599_s2 + $0x1fc] ss:$8 sps:$4 sm:$0xff]  }
 0x118   : > { %v751_v20 = vmax.f32 %v743_v17, 0.0  ;;  %3265 = vrot.lane.b32.xlu1 %v3264_v19, %s3601_s11 }
 0x11a   : > { %v3269_v22 = vpack.i.bf16 %v751_v20, %v750_v54 }
 0x11c   : > { %3270 = vrot.lane.b32.xlu1 %v3269_v22, %s3601_s11  ;;  %v3394_v22 = vld [vmem:[%s4599_s2 + $0x1b4] ss:$8 sps:$4 sm:$0xff]  }
 0x182   : > { %v3256_v24 = vpop.permute.xlu0 %3255 }
 0x183   : > { %v3258_v55 = vunpack.i.h.bf16 %v3256_v24  ;;  %v3257_v25 = vunpack.i.l.bf16 %v3256_v24 }
 0x185   : > { %v777_v26 = vsel %vm776_vm3, %v3257_v25, %v3258_v55  ;;  %v790_v30 = vmax.f32 %v745_v37, %v3258_v55  ;;  %v3397_v55 = vld [vmem:[%s4599_s2 + $0x24c] ss:$8 sps:$4 sm:$0xff]   ;;  %v3392_v25 = vld [vmem:[%s4599_s2 + $0x1b0] ss:$8 sps:$4 sm:$0xff]  }
 0x186   : > { %v3261_v23 = vpop.permute.xlu0 %3260  ;;  %v789_v33 = vmax.f32 %v744_v34, %v777_v26  ;;  %v3395_v26 = vld [vmem:[%s4599_s2 + $0x248] ss:$8 sps:$4 sm:$0xff]  }
 0x187   : > { %v3263_v27 = vunpack.i.h.bf16 %v3261_v23  ;;  %v3262_v28 = vunpack.i.l.bf16 %v3261_v23  ;;  %v807_v43 = vrot.slane %v790_v30, 1 }
 0x188   : > { %v804_v48 = vrot.slane %v789_v33, 1 }
 0x189   : > { %v792_v31 = vmax.f32 %v747_v59, %v3263_v27  ;;  %v778_v32 = vsel %vm776_vm3, %v3262_v28, %v3263_v27  ;;  %v3400_v28 = vld [vmem:[%s4599_s2 + $0x1a4] ss:$8 sps:$4 sm:$0xff]  }
 0x18a   : > { %v791_v35 = vmax.f32 %v746_v58, %v778_v32  ;;  %v3266_v36 = vpop.permute.xlu1 %3265 }
 0x18b   : > { %v808_v39 = vrot.slane %v792_v31, 1  ;;  %v3268_v40 = vunpack.i.h.bf16 %v3266_v36  ;;  %v3267_v41 = vunpack.i.l.bf16 %v3266_v36  ;;  %v3401_v36 = vld [vmem:[%s4599_s2 + $0x238] ss:$8 sps:$4 sm:$0xff]  }
 0x18c   : > { %v805_v42 = vrot.slane %v791_v35, 1 }
 0x18d   : > { %v794_v46 = vmax.f32 %v749_v11, %v3268_v40  ;;  %v779_v47 = vsel %vm776_vm3, %v3267_v41, %v3268_v40  ;;  %v809_v49 = vsel %vm803_vm4, %v807_v43, %v808_v39  ;;  %v3409_v40 = vld [vmem:[%s4599_s2 + $0x22c] ss:$8 sps:$4 sm:$0xff]  }
 0x18e   : > { %v3990_v29 = vmax.f32 %v748_v10, %v779_v47  ;;  %v3992_v37 = vpop.permute.xlu1 %3270  ;;  %v806_v50 = vsel %vm803_vm4, %v804_v48, %v805_v42  ;;  %v821_v58 = vmax.f32 %v790_v30, %v809_v49  ;;  %v3391_v10 = vld [vmem:[%s4599_s2 + $0x25c] ss:$8 sps:$4 sm:$0xff]   ;;  %v3410_v49 = vld [vmem:[%s4599_s2 + $0x180] ss:$8 sps:$4 sm:$0xff]  }
 0x18f   : > { %v812_v18 = vrot.slane %v794_v46, 1  ;;  %v3273_v34 = vunpack.i.h.bf16 %v3992_v37  ;;  %v820_v62 = vmax.f32 %v789_v33, %v806_v50  ;;  %v3403_v30 = vld [vmem:[%s4599_s2 + $0x23c] ss:$8 sps:$4 sm:$0xff]   ;;  %v3272_v43 = vunpack.i.l.bf16 %v3992_v37  ;;  %v3413_v50 = vld [vmem:[%s4599_s2 + $0x218] ss:$8 sps:$4 sm:$0xff]  }
 0x190   : > { %v3998_v51 = vrot.slane %v3990_v29, 1  ;;  %v3412_v47 = vld [vmem:[%s4599_s2 + $0x184] ss:$8 sps:$4 sm:$0xff]   ;;  %v2958_v37 = vld [vmem:[%s4599_s2 + $0x298] sm:$0xff] }
 0x191   : > { %v796_v52 = vmax.f32 %v751_v20, %v3273_v34  ;;  %v813_v56 = vsel %vm803_vm4, %v808_v39, %v812_v18  ;;  %v825_v57 = vmax.f32 %v794_v46, %v812_v18  ;;  %v3406_v39 = vld [vmem:[%s4599_s2 + $0x194] ss:$8 sps:$4 sm:$0xff]  }
 0x192   : > { %v824_v53 = vmax.f32 %v3990_v29, %v3998_v51  ;;  %v4005_v59 = vmax.f32 %v792_v31, %v813_v56  ;;  %v811_v60 = vsel %vm803_vm4, %v805_v42, %v3998_v51  ;;  %v3404_v42 = vld [vmem:[%s4599_s2 + $0x190] ss:$8 sps:$4 sm:$0xff]   ;;  %v3415_v48 = vld [vmem:[%s4599_s2 + $0x21c] ss:$8 sps:$4 sm:$0xff]   ;;  %v3421_v56 = vld [vmem:[%s4599_s2 + $0x20c] ss:$8 sps:$4 sm:$0xff]  }
 0x193   : > { %v1436_v61 = vrot.slane %v796_v52, 1  ;;  %v4009_v63 = vmax.f32 %v791_v35, %v811_v60  ;;  %v4011_v0 = vpack.c.bf16 %v825_v57, %v825_v57  ;;  %v3398_v35 = vld [vmem:[%s4599_s2 + $0x1a0] ss:$8 sps:$4 sm:$0xff]   ;;  %v3416_v57 = vld [vmem:[%s4599_s2 + $0x170] ss:$8 sps:$4 sm:$0xff]  }
 0x194   : > { %v4013_v1 = vpack.c.bf16 %v824_v53, %v824_v53  ;;  %v827_v3 = vpack.c.bf16 %v4005_v59, %v821_v58  ;;  %v3419_v53 = vld [vmem:[%s4599_s2 + $0x208] ss:$8 sps:$4 sm:$0xff]   ;;  %v3424_v58 = vld [vmem:[%s4599_s2 + $0x164] ss:$8 sps:$4 sm:$0xff]  }
 0x195   : > { %v1437_v5 = vsel %vm803_vm4, %v812_v18, %v1436_v61  ;;  %v4020_v6 = vmax.f32 %v796_v52, %v1436_v61  ;;  %v4023_v7 = vpack.c.bf16 %v4009_v63, %v820_v62  ;;  %v882_v9 = vrot.slane %v4011_v0, 1  ;;  %v3418_v52 = vld [vmem:[%s4599_s2 + $0x174] ss:$8 sps:$4 sm:$0xff]   ;;  %v3422_v62 = vld [vmem:[%s4599_s2 + $0x160] ss:$8 sps:$4 sm:$0xff]  }
 0x196   : > { %v4029_v11 = vmax.f32 %v794_v46, %v1437_v5  ;;  %2891 = vmatprep.mubr.msk.bf16.mxu0 %vm991_vm5, %v827_v3  ;;  %v881_v14 = vrot.slane %v827_v3, 1  ;;  %v879_v15 = vrot.slane %v4013_v1, 1  ;;  %v1476_v27 = vrot.slane %v827_v3, 3  ;;  %v3407_v46 = vld [vmem:[%s4599_s2 + $0x228] ss:$8 sps:$4 sm:$0xff]  }
 0x197   : > { %1209 = vmatmul.mubr.bf16.vlgmr.msra.gmra.mxu0 %v4023_v7  ;;  %v878_v17 = vrot.slane %v4023_v7, 1  ;;  %v1253_v31 = vrot.slane %v827_v3, 2  ;;  %v1254_v32 = vrot.slane %v4011_v0, 2  ;;  %v780_v18 = vsel %vm776_vm3, %v3272_v43, %v3273_v34  ;;  %v2913_v60 = vld [vmem:[%s4599_s2 + $0x1f0] sm:$0xff]  ;;  %v3425_v3 = vld [vmem:[%s4599_s2 + $0x1f8] ss:$8 sps:$4 sm:$0xff]  }
 0x198   : > { %v1447_v19 = vpack.c.bf16 %v4020_v6, %v4029_v11  ;;  %1599 = vmatpush1.bf16.msra.mxu0 %v3383_v4  ;;  %2892 = vmatprep.mubr.msk.bf16.mxu0 %vm991_vm5, %v4011_v0  ;;  %v883_v20 = vsel %vm803_vm4, %v881_v14, %v882_v9  ;;  %v795_v34 = vmax.f32 %v750_v54, %v780_v18  ;;  %v3430_v4 = vld [vmem:[%s4599_s2 + $0x154] ss:$8 sps:$4 sm:$0xff]   ;;  %v3428_v14 = vld [vmem:[%s4599_s2 + $0x150] ss:$8 sps:$4 sm:$0xff]   ;;  %v3458_v0 = vld [vmem:[%s4599_s2 + $0x2e4] ss:$8 sps:$4 sm:$0xff]  }
 0x199   : > { %2867 = vmatprep.mubr.msk.bf16.mxu1 %vm991_vm5, %v883_v20  ;;  %v880_v24 = vsel %vm803_vm4, %v878_v17, %v879_v15  ;;  %1600 = vmatprep.subr.bf16.mxu0 %v3391_v10  ;;  %v1255_v41 = vsel %vm1249_vm7, %v1253_v31, %v1254_v32  ;;  %v2980_v54 = vcombine.high %v2958_v37, %v2958_v37  ;;  %v3437_v20 = vld [vmem:[%s4599_s2 + $0x28c] ss:$8 sps:$4 sm:$0xff]   ;;  %v3444_v31 = vld [vmem:[%s4599_s2 + $0x1d0] ss:$8 sps:$4 sm:$0xff]   ;;  %v3003_v18 = vld [vmem:[%s4599_s2 + $0x340] sm:$0xff] }
 0x19a   : > { %1041 = vmatmul.mubr.bf16.vlgmr.msra.gmra.mxu1 %v880_v24  ;;  %v4058_v23 = vrot.slane %v1447_v19, 3  ;;  %v1434_v61 = vrot.slane %v795_v34, 1  ;;  %v2979_v5 = vcombine.low %v2958_v37, %v2958_v37  ;;  %v3453_v43 = vld [vmem:[%s4599_s2 + $0x2f0] ss:$8 sps:$4 sm:$0xff]   ;;  %v3468_v37 = vld [vmem:[%s4599_s2 + $0x2a0] ss:$8 sps:$4 sm:$0xff]  }
 0x19b   : > { %1376 = vmatpush1.bf16.msra.mxu1 %v3386_v16  ;;  %2868 = vmatprep.mubr.msk.bf16.mxu1 %vm991_vm5, %v882_v9  ;;  %v2935_v9 = vcombine.high %v2913_v60, %v2913_v60  ;;  %v1596_v10 = vand.u32 %v2980_v54, %v3910_v13  ;;  %v3478_v54 = vld [vmem:[%s4599_s2 + $0x324] ss:$8 sps:$4 sm:$0xff]  }
 0x19c   : > { %1601 = vmatpush1.bf16.msra.mxu0 %v3389_v21  ;;  %1377 = vmatprep.subr.bf16.mxu1 %v3394_v22  ;;  %v1478_v33 = vsel %vm1472_vm6, %v1476_v27, %v4058_v23  ;;  %v1435_v16 = vsel %vm803_vm4, %v3998_v51, %v1434_v61  ;;  %v1593_v17 = vand.u32 %v2979_v5, %v3910_v13  ;;  %v3435_v51 = vld [vmem:[%s4599_s2 + $0x288] ss:$8 sps:$4 sm:$0xff]   ;;  %v3441_v27 = vld [vmem:[%s4599_s2 + $0x278] ss:$8 sps:$4 sm:$0xff]  }
 0x19d   : > { %1602 = vmatprep.subr.bf16.mxu0 %v3397_v55  ;;  %v1373_v19 = vand.u32 %v2935_v9, %v3910_v13  ;;  %v4158_v21 = vmax.f32 %v795_v34, %v1434_v61  ;;  %v4161_v22 = vmax.f32 %v3990_v29, %v1435_v16  ;;  %v3440_v55 = vld [vmem:[%s4599_s2 + $0x1e4] ss:$8 sps:$4 sm:$0xff]   ;;  %v3024_v34 = vcombine.low %v3003_v18, %v3003_v18  ;;  %v3484_v9 = vld [vmem:[%s4600_s3 + $0x78] sm:$0xff]  }
 0x19e   : > { %v1658_v61 = vpack.c.bf16 %v4020_v6, %v4020_v6  ;;  %v3481_v6 = vld [vmem:[%s4600_s3 + $0x30] sm:$0xff]   ;;  %v3483_v5 = vld [vmem:[%s4600_s3 + $0x28] sm:$0xff]  }
 0x19f   : > { %1378 = vmatpush1.bf16.msra.mxu1 %v3392_v25  ;;  %1219 = vmatmul.mubr.bf16.gmra.mxu0 %v4013_v1  ;;  %v3443_v25 = vld [vmem:[%s4599_s2 + $0x27c] ss:$8 sps:$4 sm:$0xff]   ;;  %v1446_v29 = vpack.c.bf16 %v4158_v21, %v4161_v22  ;;  %v3488_v16 = vld [vmem:[%s4600_s3 + $0x68] sm:$0xff]  }
 0x1a0   : > { %1603 = vmatpush1.bf16.msra.mxu0 %v3395_v26  ;;  %2981 = vmatprep.mubr.msk.bf16.mxu0 %vm991_vm5, %v1478_v33  ;;  %v3438_v26 = vld [vmem:[%s4599_s2 + $0x1e0] ss:$8 sps:$4 sm:$0xff]   ;;  %v1473_v33 = vrot.slane %v4023_v7, 3 }
 0x1a1   : > { %1379 = vmatprep.subr.bf16.mxu1 %v3400_v28  ;;  %1604 = vmatprep.subr.bf16.mxu0 %v3403_v30  ;;  %v3446_v28 = vld [vmem:[%s4599_s2 + $0x1d4] ss:$8 sps:$4 sm:$0xff]   ;;  %v1474_v30 = vrot.slane %v1446_v29, 3 }
 0x1a2   : > { %1051 = vmatmul.mubr.bf16.gmra.mxu1 %v879_v15  ;;  %v2934_v15 = vcombine.low %v2913_v60, %v2913_v60  ;;  %v1655_v60 = vpack.c.bf16 %v4161_v22, %v4009_v63  ;;  %v3480_v63 = vld [vmem:[%s4600_s3 + $0x88] sm:$0xff]  }
 0x1a3   : > { %1380 = vmatpush1.bf16.msra.mxu1 %v3398_v35  ;;  %2936 = vmatprep.mubr.msk.bf16.mxu1 %vm991_vm5, %v1255_v41  ;;  %v3449_v35 = vld [vmem:[%s4599_s2 + $0x314] ss:$8 sps:$4 sm:$0xff]   ;;  %v3447_v41 = vld [vmem:[%s4599_s2 + $0x310] ss:$8 sps:$4 sm:$0xff]  }
 0x1a4   : > { %1605 = vmatpush1.bf16.msra.mxu0 %v3401_v36  ;;  %1381 = vmatprep.subr.bf16.mxu1 %v3406_v39  ;;  %v1370_v24 = vand.u32 %v2934_v15, %v3910_v13  ;;  %v1250_v36 = vrot.slane %v4023_v7, 2  ;;  %v1251_v39 = vrot.slane %v4013_v1, 2  ;;  %v3452_v7 = vld [vmem:[%s4599_s2 + $0x304] ss:$8 sps:$4 sm:$0xff]   ;;  %v3487_v15 = vld [vmem:[%s4600_s3 + $0x18] sm:$0xff]  }
 0x1a5   : > { %1606 = vmatprep.subr.bf16.mxu0 %v3409_v40  ;;  %v1475_v40 = vsel %vm1472_vm6, %v1473_v33, %v1474_v30  ;;  %v3493_v33 = vld [vmem:[%s4600_s3] sm:$0xff]  }
 0x1a6   : > { %v1252_v1 = vsel %vm1249_vm7, %v1250_v36, %v1251_v39 }
 0x1a7   : > { %1382 = vmatpush1.bf16.msra.mxu1 %v3404_v42  ;;  %v3450_v42 = vld [vmem:[%s4599_s2 + $0x300] ss:$8 sps:$4 sm:$0xff]  }
 0x1a8   : > { %1607 = vmatpush1.bf16.msra.mxu0 %v3407_v46  ;;  %1383 = vmatprep.subr.bf16.mxu1 %v3412_v47  ;;  %v3456_v46 = vld [vmem:[%s4599_s2 + $0x2e0] ss:$8 sps:$4 sm:$0xff]   ;;  %v3461_v47 = vld [vmem:[%s4599_s2 + $0x2d4] ss:$8 sps:$4 sm:$0xff]  }
 0x1a9   : > { %1608 = vmatprep.subr.bf16.mxu0 %v3415_v48  ;;  %v3459_v48 = vld [vmem:[%s4599_s2 + $0x2d0] ss:$8 sps:$4 sm:$0xff]  }
 0x1ab   : > { %1384 = vmatpush1.bf16.msra.mxu1 %v3410_v49  ;;  %v3467_v49 = vld [vmem:[%s4599_s2 + $0x2b4] ss:$8 sps:$4 sm:$0xff]  }
 0x1ac   : > { %1609 = vmatpush1.bf16.msra.mxu0 %v3413_v50  ;;  %1385 = vmatprep.subr.bf16.mxu1 %v3418_v52  ;;  %v3465_v50 = vld [vmem:[%s4599_s2 + $0x2b0] ss:$8 sps:$4 sm:$0xff]   ;;  %v3470_v52 = vld [vmem:[%s4599_s2 + $0x2a4] ss:$8 sps:$4 sm:$0xff]  }
 0x1ad   : > { %1610 = vmatprep.subr.bf16.mxu0 %v3421_v56  ;;  %v3025_v56 = vcombine.high %v3003_v18, %v3003_v18 }
 0x1af   : > { %1386 = vmatpush1.bf16.msra.mxu1 %v3416_v57  ;;  %v1796_v57 = vand.u32 %v3025_v56, %v3910_v13 }
 0x1b0   : > { %1611 = vmatpush1.bf16.msra.mxu0 %v3419_v53  ;;  %1387 = vmatprep.subr.bf16.mxu1 %v3424_v58  ;;  %v1793_v53 = vand.u32 %v3024_v34, %v3910_v13  ;;  %v3475_v58 = vld [vmem:[%s4599_s2 + $0x334] ss:$8 sps:$4 sm:$0xff]   ;;  %v3476_v13 = vld [vmem:[%s4599_s2 + $0x320] ss:$8 sps:$4 sm:$0xff]  }
 0x1b1   : > { %1612 = vmatprep.subr.bf16.mxu0 %v3427_v12  ;;  %v3473_v12 = vld [vmem:[%s4599_s2 + $0x330] ss:$8 sps:$4 sm:$0xff]  }
 0x1b3   : > { %1388 = vmatpush1.bf16.msra.mxu1 %v3422_v62  ;;  %v1657_v62 = vpack.c.bf16 %v4158_v21, %v4158_v21 }
 0x1b4   : > { %1613 = vmatpush1.bf16.msra.mxu0 %v3425_v3  ;;  %1389 = vmatprep.subr.bf16.mxu1 %v3430_v4  ;;  %v3479_v3 = vld [vmem:[%s4600_s3 + $0x38] sm:$0xff]   ;;  %v3482_v4 = vld [vmem:[%s4600_s3 + $0x80] sm:$0xff]  }
 0x1b5   : > { %1624 = vmatprep.subr.bf16.mxu0 %v1596_v10  ;;  %v3485_v10 = vld [vmem:[%s4600_s3 + $0x20] sm:$0xff]  }
 0x1b7   : > { %1390 = vmatpush1.bf16.msra.mxu1 %v3428_v14  ;;  %v3486_v14 = vld [vmem:[%s4600_s3 + $0x70] sm:$0xff]  }
 0x1b8   : > { %1625 = vmatpush2.bf16.msra.mxu0 %v1593_v17  ;;  %1401 = vmatprep.subr.bf16.mxu1 %v1373_v19  ;;  %v3489_v19 = vld [vmem:[%s4600_s3 + $0x10] sm:$0xff]  }
 0x1b9   : > { %1626 = vmatprep.subr.bf16.mxu0 %v3437_v20  ;;  %v3490_v20 = vld [vmem:[%s4600_s3 + $0x60] sm:$0xff]  }
 0x1bb   : > { %1402 = vmatpush2.bf16.msra.mxu1 %v1370_v24 }
 0x1bc   : > { %1627 = vmatpush2.bf16.msra.mxu0 %v3435_v51  ;;  %1403 = vmatprep.subr.bf16.mxu1 %v3440_v55  ;;  %v3491_v55 = vld [vmem:[%s4600_s3 + $0x8] sm:$0xff]  }
 0x1bd   : > { %1628 = vmatprep.subr.bf16.mxu0 %v3443_v25  ;;  %v3492_v25 = vld [vmem:[%s4600_s3 + $0x58] sm:$0xff]  }
 0x1bf   : > { %1404 = vmatpush2.bf16.msra.mxu1 %v3438_v26 }
 0x1c0   : > { %1629 = vmatpush2.bf16.msra.mxu0 %v3441_v27  ;;  %1405 = vmatprep.subr.bf16.mxu1 %v3446_v28 }
 0x1c1   : > { %2038 = vmatprep.subr.bf16.mxu0 %v3599_v2 }
 0x1c3   : > { %1406 = vmatpush2.bf16.msra.mxu1 %v3444_v31  ;;  %1631 = vmatmul.mubr.bf16.vlgmr.msra.gmra.mxu0 %v1475_v40 }
 0x1c4   : > { %2982 = vmatprep.mubr.msk.bf16.mxu0 %vm991_vm5, %v4058_v23  ;;  %1798 = vmatprep.subr.bf16.mxu1 %v3449_v35  ;;  %v3455_v23 = vld [vmem:[%s4599_s2 + $0x2f4] ss:$8 sps:$4 sm:$0xff]  }
 0x1c5   : > { %2039 = vmatpush1.bf16.msra.mxu0 %v3480_v63 }
 0x1c6   : > { %1408 = vmatmul.mubr.bf16.vlgmr.msra.gmra.mxu1 %v1252_v1  ;;  %2040 = vmatprep.subr.bf16.mxu0 %v3599_v2 }
 0x1c7   : > { %2937 = vmatprep.mubr.msk.bf16.mxu1 %vm991_vm5, %v1254_v32  ;;  %1799 = vmatpush1.bf16.msra.mxu1 %v3447_v41  ;;  %v1656_v32 = vpack.c.bf16 %v4029_v11, %v4005_v59  ;;  %v3464_v59 = vld [vmem:[%s4599_s2 + $0x2c4] ss:$8 sps:$4 sm:$0xff]   ;;  %v3462_v11 = vld [vmem:[%s4599_s2 + $0x2c0] ss:$8 sps:$4 sm:$0xff]  }
 0x1c8   : > { %1800 = vmatprep.subr.bf16.mxu1 %v3452_v7 }
 0x1c9   : > { %2041 = vmatpush1.bf16.msra.mxu0 %v3482_v4  ;;  %v2033_v4 = vsel %vm803_vm4, 4294967295, %v3600_v8 }
 0x1ca   : > { %2042 = vmatprep.subr.bf16.mxu0 %v3599_v2 }
 0x1cb   : > { %1641 = vmatmul.mubr.bf16.gmra.mxu0 %v1474_v30  ;;  %1801 = vmatpush1.bf16.msra.mxu1 %v3450_v42 }
 0x1cc   : > { %1802 = vmatprep.subr.bf16.mxu1 %v3455_v23 }
 0x1cd   : > { %2043 = vmatpush1.bf16.msra.mxu0 %v3484_v9 }
 0x1ce   : > { %1418 = vmatmul.mubr.bf16.gmra.mxu1 %v1251_v39  ;;  %2044 = vmatprep.subr.bf16.mxu0 %v3599_v2 }
 0x1cf   : > { %1803 = vmatpush1.bf16.msra.mxu1 %v3453_v43  ;;  %3026 = vmatprep.mubr.msk.bf16.mxu1 %vm991_vm5, %v1656_v32 }
 0x1d0   : > { %1804 = vmatprep.subr.bf16.mxu1 %v3458_v0 }
 0x1d1   : > { %2045 = vmatpush1.bf16.msra.mxu0 %v3486_v14 }
 0x1d2   : > { %2046 = vmatprep.subr.bf16.mxu0 %v3599_v2 }
 0x1d3   : > { %1805 = vmatpush1.bf16.msra.mxu1 %v3456_v46 }
 0x1d4   : > { %1806 = vmatprep.subr.bf16.mxu1 %v3461_v47 }
 0x1d5   : > { %2047 = vmatpush1.bf16.msra.mxu0 %v3488_v16  ;;  %v3496_v16 = vld [vmem:[%s4600_s3 + $0x98] sm:$0xff]  }
 0x1d6   : > { %2048 = vmatprep.subr.bf16.mxu0 %v3599_v2 }
 0x1d7   : > { %1807 = vmatpush1.bf16.msra.mxu1 %v3459_v48 }
 0x1d8   : > { %1808 = vmatprep.subr.bf16.mxu1 %v3464_v59 }
 0x1d9   : > { %2049 = vmatpush1.bf16.msra.mxu0 %v3490_v20 }
 0x1da   : > { %2050 = vmatprep.subr.bf16.mxu0 %v3599_v2 }
 0x1db   : > { %1809 = vmatpush1.bf16.msra.mxu1 %v3462_v11 }
 0x1dc   : > { %1810 = vmatprep.subr.bf16.mxu1 %v3467_v49 }
 0x1dd   : > { %2051 = vmatpush1.bf16.msra.mxu0 %v3492_v25 }
 0x1de   : > { %2052 = vmatprep.subr.bf16.mxu0 %v3599_v2 }
 0x1df   : > { %1811 = vmatpush1.bf16.msra.mxu1 %v3465_v50 }
 0x1e0   : > { %1812 = vmatprep.subr.bf16.mxu1 %v3470_v52 }
 0x1e3   : > { %1813 = vmatpush1.bf16.msra.mxu1 %v3468_v37 }
 0x1e4   : > { %1824 = vmatprep.subr.bf16.mxu1 %v1796_v57 }
 0x1e7   : > { %1825 = vmatpush2.bf16.msra.mxu1 %v1793_v53 }
 0x1e8   : > { %1826 = vmatprep.subr.bf16.mxu1 %v3475_v58 }
 0x1eb   : > { %1827 = vmatpush2.bf16.msra.mxu1 %v3473_v12 }
 0x1ec   : > { %1828 = vmatprep.subr.bf16.mxu1 %v3478_v54  ;;  %v3028_v54 = vld [vmem:[%s4602_s5 + $0x1] ss:$4 sm:$0x3] }
 0x1ed   : > { %v1865_v63 = vrot.slane %v3028_v54, %v732_v45 }
 0x1ef   : > { %1829 = vmatpush2.bf16.msra.mxu1 %v3476_v13 }
 0x1f0   : > { %2143 = vmatprep.subr.bf16.mxu1 %v3599_v2 }
 0x1f2   : > { %1831 = vmatmul.mubr.bf16.vlgmr.msra.gmra.mxu1 %v1655_v60 }
 0x1f3   : > { %3027 = vmatprep.mubr.msk.bf16.mxu1 %vm991_vm5, %v1658_v61  ;;  %2144 = vmatpush1.bf16.msra.mxu1 %v3479_v3 }
 0x1f4   : > { %2145 = vmatprep.subr.bf16.mxu1 %v3599_v2 }
 0x1f7   : > { %2146 = vmatpush1.bf16.msra.mxu1 %v3481_v6  ;;  %v3494_v6 = vld [vmem:[%s4600_s3 + $0x50] sm:$0xff]  }
 0x1f8   : > { %2147 = vmatprep.subr.bf16.mxu1 %v3599_v2  ;;  %2053 = vmatpush1.bf16.msra.mxu0 %v3494_v6 }
 0x1f9   : > { %2066 = vmatprep.subr.bf16.mxu0 %v3599_v2 }
 0x1fa   : > { %1841 = vmatmul.mubr.bf16.gmra.mxu1 %v1657_v62  ;;  %v1861_v62 = vrot.slane %v3028_v54, %v728_v44  ;;  %v4349_v44 = vsel %vm2032_vm8, %v2033_v4, 0  ;;  %v3500_v4 = vld [vmem:[%s4600_s3 + $0xd8] sm:$0xff]  }
 0x1fb   : > { %2148 = vmatpush1.bf16.msra.mxu1 %v3483_v5  ;;  %v3495_v5 = vld [vmem:[%s4600_s3 + $0x48] sm:$0xff]  }
 0x1fc   : > { %2149 = vmatprep.subr.bf16.mxu1 %v3599_v2  ;;  %v2141_v45 = vand.u32 %v3495_v5, %v4349_v44 }
 0x1ff   : > { %2150 = vmatpush1.bf16.msra.mxu1 %v3485_v10 }
 0x200   : > { %2151 = vmatprep.subr.bf16.mxu1 %v3599_v2 }
 0x203   : > { %2152 = vmatpush1.bf16.msra.mxu1 %v3487_v15 }
 0x204   : > { %2153 = vmatprep.subr.bf16.mxu1 %v3599_v2 }
 0x207   : > { %2154 = vmatpush1.bf16.msra.mxu1 %v3489_v19 }
 0x208   : > { %2155 = vmatprep.subr.bf16.mxu1 %v3599_v2 }
 0x20b   : > { %2156 = vmatpush1.bf16.msra.mxu1 %v3491_v55 }
 0x20c   : > { %2157 = vmatprep.subr.bf16.mxu1 %v3599_v2 }
 0x20f   : > { %2158 = vmatpush1.bf16.msra.mxu1 %v3493_v33 }
 0x210   : > { %2171 = vmatprep.subr.bf16.mxu1 %v3599_v2 }
 0x213   : > { %2172 = vmatpush2.bf16.msra.mxu1 %v2141_v45  ;;  %v3504_v45 = vld [vmem:[%s4600_s3 + $0xc8] sm:$0xff]  }
 0x214   : > { %2173 = vmatprep.subr.bf16.mxu1 %v3599_v2 }
 0x257   : > { %v1210_v17 = vpop.f32.mrf.mxu0 }
 0x259   : > { %v1212_v21 = vpop.f32.mrf.mxu0 }
 0x25a   : > { %v1042_v22 = vpop.f32.mrf.mxu1 }
 0x25b   : > { %v1211_v24 = vadd.f32 %v1210_v17, %v1042_v22  ;;  %v1214_v51 = vpop.f32.mrf.mxu0 }
 0x25c   : > { %v1044_v29 = vpop.f32.mrf.mxu1 }
 0x25d   : > { %v1213_v26 = vadd.f32 %v1212_v21, %v1044_v29  ;;  %v1216_v27 = vpop.f32.mrf.mxu0  ;;  %v2036_v21 = vand.u32 %v3496_v16, %v4349_v44  ;;  %v3505_v16 = vld [vmem:[%s4600_s3 + $0x110] sm:$0xff]  }
 0x25e   : > { %v1046_v28 = vpop.f32.mrf.mxu1 }
 0x25f   : > { %v1215_v30 = vadd.f32 %v1214_v51, %v1046_v28  ;;  %v1220_v31 = vpop.f32.mrf.mxu0  ;;  %2067 = vmatpush2.bf16.msra.mxu0 %v2036_v21  ;;  %v3509_v21 = vld [vmem:[%s4600_s3 + $0x100] sm:$0xff]  }
 0x260   : > { %v1048_v35 = vpop.f32.mrf.mxu1  ;;  %2068 = vmatprep.subr.bf16.mxu0 %v3599_v2 }
 0x261   : > { %v1217_v36 = vadd.f32 %v1216_v27, %v1048_v35  ;;  %v1222_v39 = vpop.f32.mrf.mxu0  ;;  %v3498_v35 = vld [vmem:[%s4600_s3 + $0x90] sm:$0xff]  }
 0x262   : > { %v1052_v40 = vpop.f32.mrf.mxu1 }
 0x263   : > { %v1221_v41 = vadd.f32 %v1220_v31, %v1052_v40  ;;  %v1224_v7 = vpop.f32.mrf.mxu0  ;;  %2069 = vmatpush2.bf16.msra.mxu0 %v3498_v35 }
 0x264   : > { %v1054_v1 = vpop.f32.mrf.mxu1  ;;  %2279 = vmatprep.subr.bf16.mxu0 %v3599_v2 }
 0x265   : > { %v1223_v42 = vadd.f32 %v1222_v39, %v1054_v1  ;;  %v1225_v23 = vpop.f32.mrf.mxu0 }
 0x266   : > { %v1056_v43 = vpop.f32.mrf.mxu1 }
 0x268   : > { %v1057_v0 = vpop.f32.mrf.mxu1 }
 0x283   : > { %v1632_v32 = vpop.f32.mrf.mxu0 }
 0x285   : > { %v1634_v46 = vpop.f32.mrf.mxu0 }
 0x286   : > { %v1409_v47 = vpop.f32.mrf.mxu1 }
 0x287   : > { %v1636_v48 = vpop.f32.mrf.mxu0  ;;  %v1426_v12 = vadd.f32 %v1409_v47, %v1211_v24 }
 0x288   : > { %v1411_v59 = vpop.f32.mrf.mxu1 }
 0x289   : > { %v1638_v11 = vpop.f32.mrf.mxu0  ;;  %v1427_v13 = vadd.f32 %v1411_v59, %v1213_v26  ;;  %v1649_v61 = vadd.f32 %v1632_v32, %v1426_v12  ;;  %v3497_v26 = vld [vmem:[%s4600_s3 + $0x40] sm:$0xff]  }
 0x28a   : > { %v1413_v49 = vpop.f32.mrf.mxu1  ;;  %2174 = vmatpush2.bf16.msra.mxu1 %v3497_v26 }
 0x28b   : > { %v1642_v18 = vpop.f32.mrf.mxu0  ;;  %v1428_v60 = vadd.f32 %v1413_v49, %v1215_v30  ;;  %v1650_v14 = vadd.f32 %v1634_v46, %v1427_v13  ;;  %2411 = vmatprep.subr.bf16.mxu1 %v3599_v2 }
 0x28c   : > { %v1415_v50 = vpop.f32.mrf.mxu1 }
 0x28d   : > { %v1644_v52 = vpop.f32.mrf.mxu0  ;;  %v1429_v9 = vadd.f32 %v1415_v50, %v1217_v36  ;;  %v1651_v19 = vadd.f32 %v1636_v48, %v1428_v60 }
 0x28e   : > { %v1419_v56 = vpop.f32.mrf.mxu1 }
 0x28f   : > { %v1646_v37 = vpop.f32.mrf.mxu0  ;;  %v1430_v15 = vadd.f32 %v1419_v56, %v1221_v41  ;;  %v1652_v55 = vadd.f32 %v1638_v11, %v1429_v9 }
 0x290   : > { %v1421_v34 = vpop.f32.mrf.mxu1 }
 0x291   : > { %v1647_v57 = vpop.f32.mrf.mxu0  ;;  %v1431_v22 = vadd.f32 %v1421_v34, %v1223_v42  ;;  %v1653_v29 = vadd.f32 %v1642_v18, %v1430_v15  ;;  %v3502_v15 = vld [vmem:[%s4600_s3 + $0xd0] sm:$0xff]  }
 0x292   : > { %v1423_v53 = vpop.f32.mrf.mxu1 }
 0x293   : > { %v1654_v40 = vadd.f32 %v1644_v52, %v1431_v22 }
 0x294   : > { %v1424_v58 = vpop.f32.mrf.mxu1 }
 0x2b2   : > { %v1832_v3 = vpop.f32.mrf.mxu1 }
 0x2b3   : > { %v1849_v10 = vadd.f32 %v1832_v3, %v1649_v61 }
 0x2b4   : > { %v1834_v38 = vpop.f32.mrf.mxu1 }
 0x2b5   : > { %v1868_v17 = vadd.f32 %v1861_v62, %v1849_v10  ;;  %v1850_v8 = vadd.f32 %v1834_v38, %v1650_v14  ;;  %v3501_v10 = vld [vmem:[%s4600_s3 + $0x120] sm:$0xff]   ;;  %v3503_v38 = vld [vmem:[%s4600_s3 + $0x118] sm:$0xff]  }
 0x2b6   : > { %v1836_v20 = vpop.f32.mrf.mxu1 }
 0x2b7   : > { %v1869_v24 = vadd.f32 %v1865_v63, %v1850_v8  ;;  %v1851_v51 = vadd.f32 %v1836_v20, %v1651_v19  ;;  %v1874_v27 = vmax.f32 %v1868_v17, 0.0  ;;  %v3506_v17 = vld [vmem:[%s4600_s3 + $0xc0] sm:$0xff]   ;;  %v3507_v8 = vld [vmem:[%s4600_s3 + $0x108] sm:$0xff]   ;;  %v3508_v20 = vld [vmem:[%s4600_s3 + $0xb8] sm:$0xff]  }
 0x2b8   : > { %v1838_v25 = vpop.f32.mrf.mxu1 }
 0x2b9   : > { %v1875_v28 = vmax.f32 %v1869_v24, 0.0  ;;  %v4361_v30 = vadd.f32 %v1861_v62, %v1851_v51  ;;  %v1852_v31 = vadd.f32 %v1838_v25, %v1652_v55  ;;  %v3510_v24 = vld [vmem:[%s4600_s3 + $0xb0] sm:$0xff]   ;;  %v3511_v51 = vld [vmem:[%s4600_s3 + $0xf8] sm:$0xff]  }
 0x2ba   : > { %v1842_v33 = vpop.f32.mrf.mxu1 }
 0x2bb   : > { %v1871_v36 = vadd.f32 %v1865_v63, %v1852_v31  ;;  %v1853_v39 = vadd.f32 %v1842_v33, %v1653_v29  ;;  %v3274_v41 = vpack.i.bf16 %v1875_v28, %v1874_v27  ;;  %v1876_v1 = vmax.f32 %v4361_v30, 0.0  ;;  %v3512_v29 = vld [vmem:[%s4600_s3 + $0xa8] sm:$0xff]   ;;  %v3514_v31 = vld [vmem:[%s4600_s3 + $0xa0] sm:$0xff]  }
 0x2bc   : > { %v1844_v7 = vpop.f32.mrf.mxu1  ;;  %v3516_v33 = vld [vmem:[%s4600_s3 + $0xe8] sm:$0xff]  }
 0x2bd   : > { %v1877_v42 = vmax.f32 %v1871_v36, 0.0  ;;  %v4369_v23 = vadd.f32 %v1861_v62, %v1853_v39  ;;  %v1854_v43 = vadd.f32 %v1844_v7, %v1654_v40  ;;  %3275 = vrot.lane.b32.xlu0 %v3274_v41, %s3601_s11  ;;  %v3499_v62 = vld [vmem:[%s4600_s3 + $0x128] sm:$0xff]   ;;  %v2277_v40 = vand.u32 %v3516_v33, %v4349_v44  ;;  %v3517_v7 = vld [vmem:[%s4600_s3 + $0x130] sm:$0xff]  }
 0x2be   : > { %v1846_v0 = vpop.f32.mrf.mxu1 }
 0x2bf   : > { %v4373_v32 = vadd.f32 %v1865_v63, %v1854_v43  ;;  %v3279_v46 = vpack.i.bf16 %v1877_v42, %v1876_v1  ;;  %v1878_v48 = vmax.f32 %v4369_v23, 0.0  ;;  %v3529_v23 = vld [vmem:[%s4601_s4 + $0x38] ss:$0 sps:$4 sm:$0xff]  }
 0x2c0   : > { %v1847_v47 = vpop.f32.mrf.mxu1 }
 0x2c1   : > { %v1879_v59 = vmax.f32 %v4373_v32, 0.0  ;;  %3280 = vrot.lane.b32.xlu1 %v3279_v46, %s3601_s11  ;;  %v3519_v32 = vld [vmem:[%s4600_s3 + $0x178] sm:$0xff]   ;;  %v3520_v47 = vld [vmem:[%s4600_s3 + $0x170] sm:$0xff]  }
 0x2c3   : > { %v3284_v11 = vpack.i.bf16 %v1879_v59, %v1878_v48 }
 0x2c5   : > { %3285 = vrot.lane.b32.xlu0 %v3284_v11, %s3601_s11  ;;  %v3522_v11 = vld [vmem:[%s4600_s3 + $0x160] sm:$0xff]  }
 0x32f   : > { %v3276_v49 = vpop.permute.xlu0 %3275 }
 0x330   : > { %v3278_v18 = vunpack.i.h.bf16 %v3276_v49  ;;  %v3277_v50 = vunpack.i.l.bf16 %v3276_v49  ;;  %v3523_v49 = vld [vmem:[%s4600_s3 + $0x158] sm:$0xff]  }
 0x332   : > { %v1908_v52 = vmax.f32 %v1875_v28, %v3278_v18  ;;  %v1898_v56 = vsel %vm776_vm3, %v3277_v50, %v3278_v18  ;;  %v3515_v28 = vld [vmem:[%s4600_s3 + $0x138] sm:$0xff]   ;;  %v3524_v18 = vld [vmem:[%s4600_s3 + $0x150] sm:$0xff]  }
 0x333   : > { %v1907_v37 = vmax.f32 %v1874_v27, %v1898_v56  ;;  %v3281_v34 = vpop.permute.xlu1 %3280  ;;  %v3513_v27 = vld [vmem:[%s4600_s3 + $0xf0] sm:$0xff]   ;;  %v2409_v36 = vand.u32 %v3515_v28, %v4349_v44 }
 0x334   : > { %v1916_v57 = vrot.slane %v1908_v52, 2  ;;  %v3283_v53 = vunpack.i.h.bf16 %v3281_v34  ;;  %v3282_v19 = vunpack.i.l.bf16 %v3281_v34  ;;  %v3527_v34 = vld [vmem:[%s4600_s3 + $0x188] sm:$0xff]  }
 0x335   : > { %v1915_v58 = vrot.slane %v1907_v37, 2 }
 0x336   : > { %v1920_v12 = vmax.f32 %v1908_v52, %v1916_v57  ;;  %v1910_v54 = vmax.f32 %v1877_v42, %v3283_v53  ;;  %v1899_v22 = vsel %vm776_vm3, %v3282_v19, %v3283_v53  ;;  %v3518_v42 = vld [vmem:[%s4600_s3 + $0xe0] sm:$0xff]   ;;  %v3525_v52 = vld [vmem:[%s4600_s3 + $0x148] sm:$0xff]   ;;  %v2546_v53 = vand.u32 %v3527_v34, %v4349_v44 }
 0x337   : > { %v1919_v13 = vmax.f32 %v1907_v37, %v1915_v58  ;;  %v1909_v55 = vmax.f32 %v1876_v1, %v1899_v22  ;;  %v3286_v25 = vpop.permute.xlu0 %3285  ;;  %v3526_v37 = vld [vmem:[%s4600_s3 + $0x140] sm:$0xff]   ;;  %v2659_v44 = vsel %vm999_vm2, %v3529_v23, 0 }
 0x338   : > { %v1922_v60 = vpack.c.bf16 %v1920_v12, %v1920_v12  ;;  %v2186_v61 = vrot.slane %v1910_v54, 2  ;;  %v3288_v26 = vunpack.i.h.bf16 %v3286_v25  ;;  %v3287_v50 = vunpack.i.l.bf16 %v3286_v25  ;;  %v3528_v12 = vld [vmem:[%s4600_s3 + $0x180] sm:$0xff]  }
 0x339   : > { %v1921_v3 = vpack.c.bf16 %v1919_v13, %v1919_v13  ;;  %v2185_v30 = vrot.slane %v1909_v55, 2 }
 0x33a   : > { %v2190_v63 = vmax.f32 %v1910_v54, %v2186_v61  ;;  %3070 = vmatprep.mubr.msk.bf16.mxu1 %vm2028_vm9, %v1922_v60  ;;  %v1967_v6 = vrot.slane %v1922_v60, 2  ;;  %v1912_v35 = vmax.f32 %v1879_v59, %v3288_v26  ;;  %v3521_v59 = vld [vmem:[%s4600_s3 + $0x168] sm:$0xff]   ;;  %v1900_v56 = vsel %vm776_vm3, %v3287_v50, %v3288_v26  ;;  %v3530_v60 = vld [vmem:[%s4601_s4 + $0x30] sm:$0xff]   ;;  %v3532_v61 = vld [vmem:[%s4601_s4 + $0x20] sm:$0xff]  }
 0x33b   : > { %v1966_v5 = vrot.slane %v1921_v3, 2  ;;  %2176 = vmatmul.mubr.bf16.vlgmr.msra.gmra.mxu1 %v1921_v3  ;;  %v2189_v39 = vmax.f32 %v1909_v55, %v2185_v30  ;;  %v1911_v57 = vmax.f32 %v1878_v48, %v1900_v56  ;;  %v3602_v48 = vmov 0.0   ;;  %v3534_v3 = vld [vmem:[%s4601_s4 + $0x10] sm:$0xff]   ;;  %v2589_v26 = vld [vmem:[%s4602_s5 + $0x2] sm:$0x1] }
 0x33c   : > { %v2192_v9 = vpack.c.bf16 %v2190_v63, %v2190_v63  ;;  %2412 = vmatpush1.bf16.msra.mxu1 %v3499_v62  ;;  %3059 = vmatprep.mubr.msk.bf16.mxu0 %vm2028_vm9, %v1967_v6  ;;  %v2455_v41 = vrot.slane %v1912_v35, 2  ;;  %v3533_v62 = vld [vmem:[%s4601_s4 + $0x18] sm:$0xff]   ;;  %v3535_v63 = vld [vmem:[%s4601_s4 + $0x8] sm:$0xff]   ;;  %v3536_v6 = vld [vmem:[%s4601_s4] sm:$0xff]  }
 0x33d   : > { %2071 = vmatmul.mubr.bf16.vlgmr.msra.gmra.mxu0 %v1966_v5  ;;  %2413 = vmatprep.subr.bf16.mxu1 %v3599_v2  ;;  %v2191_v1 = vpack.c.bf16 %v2189_v39, %v2189_v39  ;;  %v2454_v58 = vrot.slane %v1911_v57, 2  ;;  %v2608_v39 = vld [vmem:[%s4602_s5 + $0x3] sm:$0x1] }
 0x33e   : > { %v2344_v14 = vrot.slane %v2192_v9, 2  ;;  %2280 = vmatpush1.bf16.msra.mxu0 %v3500_v4  ;;  %3101 = vmatprep.mubr.msk.bf16.mxu0 %vm2028_vm9, %v2192_v9  ;;  %v2459_v43 = vmax.f32 %v1912_v35, %v2455_v41 }
 0x33f   : > { %2281 = vmatprep.subr.bf16.mxu0 %v3599_v2  ;;  %v2343_v0 = vrot.slane %v2191_v1, 2  ;;  %v2458_v54 = vmax.f32 %v1911_v57, %v2454_v58 }
 0x340   : > { %2414 = vmatpush1.bf16.msra.mxu1 %v3501_v10  ;;  %3132 = vmatprep.mubr.msk.bf16.mxu1 %vm2028_vm9, %v2344_v14  ;;  %v2461_v46 = vpack.c.bf16 %v2459_v43, %v2459_v43 }
 0x341   : > { %2415 = vmatprep.subr.bf16.mxu1 %v3599_v2  ;;  %v2460_v13 = vpack.c.bf16 %v2458_v54, %v2458_v54 }
 0x342   : > { %2282 = vmatpush1.bf16.msra.mxu0 %v3502_v15 }
 0x343   : > { %2283 = vmatprep.subr.bf16.mxu0 %v3599_v2 }
 0x344   : > { %2416 = vmatpush1.bf16.msra.mxu1 %v3503_v38 }
 0x345   : > { %2417 = vmatprep.subr.bf16.mxu1 %v3599_v2 }
 0x346   : > { %2284 = vmatpush1.bf16.msra.mxu0 %v3504_v45 }
 0x347   : > { %2285 = vmatprep.subr.bf16.mxu0 %v3599_v2 }
 0x348   : > { %2418 = vmatpush1.bf16.msra.mxu1 %v3505_v16 }
 0x349   : > { %2419 = vmatprep.subr.bf16.mxu1 %v3599_v2 }
 0x34a   : > { %2286 = vmatpush1.bf16.msra.mxu0 %v3506_v17 }
 0x34b   : > { %2287 = vmatprep.subr.bf16.mxu0 %v3599_v2 }
 0x34c   : > { %2420 = vmatpush1.bf16.msra.mxu1 %v3507_v8 }
 0x34d   : > { %2421 = vmatprep.subr.bf16.mxu1 %v3599_v2 }
 0x34e   : > { %2288 = vmatpush1.bf16.msra.mxu0 %v3508_v20 }
 0x34f   : > { %2289 = vmatprep.subr.bf16.mxu0 %v3599_v2 }
 0x350   : > { %2422 = vmatpush1.bf16.msra.mxu1 %v3509_v21 }
 0x351   : > { %2423 = vmatprep.subr.bf16.mxu1 %v3599_v2 }
 0x352   : > { %2290 = vmatpush1.bf16.msra.mxu0 %v3510_v24 }
 0x353   : > { %2291 = vmatprep.subr.bf16.mxu0 %v3599_v2 }
 0x354   : > { %2424 = vmatpush1.bf16.msra.mxu1 %v3511_v51 }
 0x355   : > { %2425 = vmatprep.subr.bf16.mxu1 %v3599_v2 }
 0x356   : > { %2292 = vmatpush1.bf16.msra.mxu0 %v3512_v29 }
 0x357   : > { %2293 = vmatprep.subr.bf16.mxu0 %v3599_v2 }
 0x358   : > { %2426 = vmatpush1.bf16.msra.mxu1 %v3513_v27 }
 0x359   : > { %2439 = vmatprep.subr.bf16.mxu1 %v3599_v2 }
 0x35a   : > { %2294 = vmatpush1.bf16.msra.mxu0 %v3514_v31 }
 0x35b   : > { %2307 = vmatprep.subr.bf16.mxu0 %v3599_v2 }
 0x35c   : > { %2440 = vmatpush2.bf16.msra.mxu1 %v2409_v36 }
 0x35d   : > { %2441 = vmatprep.subr.bf16.mxu1 %v3599_v2 }
 0x35e   : > { %2308 = vmatpush2.bf16.msra.mxu0 %v2277_v40 }
 0x35f   : > { %2309 = vmatprep.subr.bf16.mxu0 %v3599_v2 }
 0x360   : > { %2442 = vmatpush2.bf16.msra.mxu1 %v3517_v7 }
 0x361   : > { %3186 = vmatprep.subr.bf16.mxu1 %v3602_v48 }
 0x362   : > { %2310 = vmatpush2.bf16.msra.mxu0 %v3518_v42 }
 0x363   : > { %2444 = vmatmul.mubr.bf16.vlgmr.msra.gmra.mxu1 %v2343_v0  ;;  %2548 = vmatprep.subr.bf16.mxu0 %v3599_v2 }
 0x364   : > { %3187 = vmatpush3.bf16.msra.mxu1 %v2659_v44  ;;  %3202 = vmatprep.mubr.msk.bf16.mxu1 %vm3603_vm10, %v3602_v48 }
 0x365   : > { %2312 = vmatmul.mubr.bf16.vlgmr.msra.gmra.mxu0 %v2191_v1  ;;  %3188 = vmatprep.subr.bf16.mxu1 %v3602_v48 }
 0x366   : > { %2549 = vmatpush1.bf16.msra.mxu0 %v3519_v32  ;;  %3163 = vmatprep.mubr.msk.bf16.mxu0 %vm2028_vm9, %v2461_v46 }
 0x367   : > { %2550 = vmatprep.subr.bf16.mxu0 %v3599_v2 }
 0x368   : > { %3189 = vmatpush3.bf16.msra.mxu1 %v3530_v60 }
 0x369   : > { %3190 = vmatprep.subr.bf16.mxu1 %v3602_v48 }
 0x36a   : > { %2551 = vmatpush1.bf16.msra.mxu0 %v3520_v47 }
 0x36b   : > { %2552 = vmatprep.subr.bf16.mxu0 %v3599_v2 }
 0x36e   : > { %2553 = vmatpush1.bf16.msra.mxu0 %v3521_v59 }
 0x36f   : > { %2554 = vmatprep.subr.bf16.mxu0 %v3599_v2 }
 0x372   : > { %2555 = vmatpush1.bf16.msra.mxu0 %v3522_v11 }
 0x373   : > { %2556 = vmatprep.subr.bf16.mxu0 %v3599_v2 }
 0x376   : > { %2557 = vmatpush1.bf16.msra.mxu0 %v3523_v49 }
 0x377   : > { %2558 = vmatprep.subr.bf16.mxu0 %v3599_v2 }
 0x37a   : > { %2559 = vmatpush1.bf16.msra.mxu0 %v3524_v18 }
 0x37b   : > { %2560 = vmatprep.subr.bf16.mxu0 %v3599_v2 }
 0x37e   : > { %2561 = vmatpush1.bf16.msra.mxu0 %v3525_v52 }
 0x37f   : > { %2562 = vmatprep.subr.bf16.mxu0 %v3599_v2 }
 0x382   : > { %2563 = vmatpush1.bf16.msra.mxu0 %v3526_v37 }
 0x383   : > { %2576 = vmatprep.subr.bf16.mxu0 %v3599_v2 }
 0x386   : > { %2577 = vmatpush2.bf16.msra.mxu0 %v2546_v53 }
 0x387   : > { %2578 = vmatprep.subr.bf16.mxu0 %v3599_v2  ;;  %v3531_v2 = vld [vmem:[%s4601_s4 + $0x28] sm:$0xff]  }
 0x388   : > { %3191 = vmatpush3.bf16.msra.mxu1 %v3531_v2 }
 0x389   : > { %3192 = vmatprep.subr.bf16.mxu1 %v3602_v48 }
 0x38a   : > { %2579 = vmatpush2.bf16.msra.mxu0 %v3528_v12 }
 0x38c   : > { %3193 = vmatpush3.bf16.msra.mxu1 %v3532_v61 }
 0x38d   : > { %2581 = vmatmul.mubr.bf16.vlgmr.msra.gmra.mxu0 %v2460_v13  ;;  %3194 = vmatprep.subr.bf16.mxu1 %v3602_v48 }
 0x390   : > { %3195 = vmatpush3.bf16.msra.mxu1 %v3533_v62 }
 0x391   : > { %3196 = vmatprep.subr.bf16.mxu1 %v3602_v48 }
 0x394   : > { %3197 = vmatpush3.bf16.msra.mxu1 %v3534_v3 }
 0x395   : > { %3198 = vmatprep.subr.bf16.mxu1 %v3602_v48 }
 0x398   : > { %3199 = vmatpush3.bf16.msra.mxu1 %v3535_v63 }
 0x399   : > { %3200 = vmatprep.subr.bf16.mxu1 %v3602_v48 }
 0x39c   : > { %3201 = vmatpush3.bf16.msra.mxu1 %v3536_v6 }
 0x3fb   : > { %v2177_v4 = vpop.f32.mrf.mxu1 }
 0x3fd   : > { %v2072_v5 = vpop.f32.mrf.mxu0  ;;  %v2179_v9 = vpop.f32.mrf.mxu1 }
 0x3fe   : > { %v2178_v10 = vadd.f32 %v2177_v4, %v2072_v5 }
 0x3ff   : > { %v2074_v14 = vpop.f32.mrf.mxu0  ;;  %v2180_v15 = vpop.f32.mrf.mxu1 }
 0x401   : > { %v2075_v38 = vpop.f32.mrf.mxu0  ;;  %v2181_v45 = vpop.f32.mrf.mxu1 }
 0x403   : > { %v2076_v16 = vpop.f32.mrf.mxu0 }
 0x423   : > { %v2445_v17 = vpop.f32.mrf.mxu1 }
 0x425   : > { %v2313_v8 = vpop.f32.mrf.mxu0  ;;  %v2447_v19 = vpop.f32.mrf.mxu1 }
 0x426   : > { %v2319_v55 = vadd.f32 %v2313_v8, %v2178_v10 }
 0x427   : > { %v2315_v20 = vpop.f32.mrf.mxu0  ;;  %v2448_v21 = vpop.f32.mrf.mxu1 }
 0x428   : > { %v2451_v25 = vadd.f32 %v2445_v17, %v2319_v55 }
 0x429   : > { %v2316_v22 = vpop.f32.mrf.mxu0  ;;  %v2449_v24 = vpop.f32.mrf.mxu1 }
 0x42b   : > { %v2317_v51 = vpop.f32.mrf.mxu0 }
 0x44d   : > { %v2582_v29 = vpop.f32.mrf.mxu0 }
 0x44e   : > { %v2588_v27 = vadd.f32 %v2582_v29, %v2451_v25 }
 0x44f   : > { %v2584_v28 = vpop.f32.mrf.mxu0 }
 0x450   : > { %v2590_v30 = vadd.f32 %v2589_v26, %v2588_v27 }
 0x451   : > { %v2585_v31 = vpop.f32.mrf.mxu0 }
 0x452   : > { %v2591_v33 = vmax.f32 %v2590_v30, 0.0 }
 0x453   : > { %v2586_v35 = vpop.f32.mrf.mxu0 }
 0x454   : > { %v2592_v36 = vpack.c.bf16 %v2591_v33, %v2591_v33 }
 0x456   : > { %3203 = vmatmul.mubr.msk.bf16.vlgmr.msra.gmra.mxu1 %vm2654_vm11, %v2592_v36 }
 0x516   : > { %v2695_v40 = vpop.f32.mrf.mxu1 }
 0x517   : > { %v2696_v41 = vadd.f32 %v2695_v40, %v2608_v39 }
 0x518   : > { %v3204_v7 = vpop.f32.mrf.mxu1 }
 0x519   : > { %v2701_v1 = vmax.f32 %v2696_v41, 0.0 }
 0x51a   : > { %v2698_v42 = vpop.f32.mrf.mxu1 }
 0x51b   : > { %2703 = vst.msk [vmem:[%s243_s15] sm:$0x1] %vm2702_vm12, %v2701_v1 }
 0x51c   : > { %v3205_v43 = vpop.f32.mrf.mxu1 }
 0x51d   : > { %3550 = shalt.err (!%p3547_p3)
}
 0x51e   : > { %s3551_s29 = scalar_lea.hbm %s4556_s18, 16  ;;  %s3555_s10 = scalar_lea.hbm %s4603_s6, 32 }
 0x51f   : > { %p3552_p4 = scmp.ne.s32.totalorder %s4556_s18, %s3551_s29  ;;  %p3556_p9 = scmp.lt.s32.totalorder %s4556_s18, %s4603_s6 }
 0x520   : > { %p3557_p10 = scmp.lt.s32.totalorder %s3555_s10, %s3551_s29 }
 0x521   : > { %p3553_p7 = pnand %p3552_p4, %p3678_p5 }
 0x522   : > { %p3558_p11 = por %p3557_p10, %p3556_p9 }
 0x523   : > { %p3554_p8 = pneg %p3553_p7 }
 0x525   : > { %p3559_p12 = pnand %p3558_p11, %p3554_p8 }
 0x527   : > { %3562 = shalt.err (!%p3559_p12)
}
 0x528   : > { %3210 = dma.vmem_to_hbm [thread:$0]  (%p3678_p5), %s4558_s16, 16, %s4556_s18, %s2705_s25  }
 0x529 PF: > { %p3216_p13 = scmp.ge.s32.totalorder %s3597_s24, 2  ;;  %s2729_s15 = sand.u32 1, %s3585_s21  }
 0x52a   : > { %s2730_s12 = scalar_lea.sflag [#allocation3], %s2729_s15 }
 0x52b   : > { %p3213_p0 = pnand %p3216_p13, %p3682_p6 }
 0x52d   : > { %p3214_p1 = pneg %p3213_p0 }
 0x52f   : > { %3580 = dma.done.wait (%p3214_p1), %s2730_s12, 16  }
 0x530   : > { %3582 = vsyncadd (%p3214_p1), %s2730_s12, 4294967280  ;;  %p16_p2 = scmp.ge.s32.totalorder %s3665_s27, 4   ;;  %s4606_s21 = smov %s3589_s22 }
 0x531   : > { %s4607_s22 = smov %s3593_s23  ;;  %s4608_s23 = smov %s3676_s30 }
 0x532   : > { %s4609_s24 = smov %s3665_s27  ;;  %18 = sbr.rel (!%p16_p2) target bundleno = 3 (0x3), region = 92 }
 0x537   :  { %2734 = vsyncpa [#allocation3], 1 }
 0x538   :  { %2736 = vsyncpa [#allocation3 + $0x1], 1 }

</bundles_post_ra>
